<compile_context>
chip_gen: v7x
topology: tpu7x:2x2x1
jax: 0.10.0
libtpu: 0.0.40
codegen_flags: <defaults>
</compile_context>

<pallas_src>
import functools

import jax
import jax.numpy as jnp
import numpy as np
from jax.experimental import pallas as pl
from jax.experimental.pallas import tpu as pltpu

NUM_ORDERS = 4


def _moa_kernel(x_ref, perm_ref,
                ow_ref, ob_ref,
                qw_ref, qb_ref, kw_ref, kb_ref, vw_ref, vb_ref,
                pw_ref, pb_ref, outw_ref, outb_ref,
                o_ref, *, num_heads, scale):
    x = x_ref[0]                              # (L, D) bf16
    L, D = x.shape
    Do = ow_ref.shape[-1]
    hd = Do // num_heads

    out_acc = jnp.zeros((L, D), jnp.float32)  # cross-order accumulator (f32)

    for o in range(NUM_ORDERS):               # static unroll; weights resident
        # order{o}_nn on unpermuted x, then permute rows: (P x) @ W == P (x @ W).
        t = jnp.dot(x, ow_ref[o], preferred_element_type=jnp.float32)    # (L, Do)
        if o == 0:                            # order 1 is the identity perm
            y = t + ob_ref[o]
        else:                                 # one-hot bf16 matmul = exact row pick
            y = jnp.dot(perm_ref[o], t.astype(jnp.bfloat16),
                        preferred_element_type=jnp.float32) + ob_ref[o]
        y_bf = y.astype(jnp.bfloat16)

        q = jnp.dot(y_bf, qw_ref[o], preferred_element_type=jnp.float32) + qb_ref[o]
        k = jnp.dot(y_bf, kw_ref[o], preferred_element_type=jnp.float32) + kb_ref[o]
        v = jnp.dot(y_bf, vw_ref[o], preferred_element_type=jnp.float32) + vb_ref[o]

        # scale folded into q: L*Do multiplies instead of L*L per head
        q_bf = (q * scale).astype(jnp.bfloat16)
        k_bf = k.astype(jnp.bfloat16)
        v_bf = v.astype(jnp.bfloat16)
        pw_o = pw_ref[o]                      # (Do, Do) bf16

        mh = jnp.zeros((L, Do), jnp.float32)  # o-projection accumulator
        for h in range(num_heads):            # static unroll (tiny head count)
            sl = slice(h * hd, (h + 1) * hd)
            dots = jax.lax.dot_general(
                q_bf[:, sl], k_bf[:, sl], (((1,), (1,)), ((), ())),
                preferred_element_type=jnp.float32)                      # (L, L)
            # softmax in f32; divide replaced by EUP approx reciprocal
            dots = dots - jnp.max(dots, axis=-1, keepdims=True)
            e = jnp.exp(dots)
            inv = pl.reciprocal(jnp.sum(e, axis=-1, keepdims=True), approx=True)
            p = (e * inv).astype(jnp.bfloat16)
            ho = jnp.dot(p, v_bf[:, sl], preferred_element_type=jnp.float32)
            # concat(head_outs) @ pw  ==  sum_h head_out_h @ pw[h*hd:(h+1)*hd, :]
            mh = mh + jnp.dot(ho.astype(jnp.bfloat16), pw_o[sl, :],
                              preferred_element_type=jnp.float32)
        mh = mh + pb_ref[o]                                              # (L, Do)

        # per-order slice of out_nn, accumulated in f32
        out_acc = out_acc + jnp.dot(mh.astype(jnp.bfloat16), outw_ref[o],
                                    preferred_element_type=jnp.float32)  # (L, D)

    o_ref[0] = out_acc + outb_ref[...]


def _perm_indices(L):
    s = int(round(L ** 0.5))
    idx1 = np.arange(L)
    idx2 = idx1[::-1].copy()
    idx3 = np.arange(L).reshape(s, s).T.reshape(-1)
    idx4 = idx3[::-1].copy()
    return [idx1, idx2, idx3, idx4]


def _perm_matrices(L):
    mats = np.zeros((NUM_ORDERS, L, L), np.float32)
    for o, idx in enumerate(_perm_indices(L)):
        mats[o, np.arange(L), idx] = 1.0          # (P @ x)[l] = x[idx[l]]
    return jnp.asarray(mats, dtype=jnp.bfloat16)


def multi_ordered_attention(x, params, num_heads):
    B, L, D = x.shape
    Do = D // NUM_ORDERS
    scale = float(Do) ** -0.5                     # matches torch: dim**-0.5, dim=Do

    x_bf = x.astype(jnp.bfloat16)
    perm = _perm_matrices(L)

    kernel = functools.partial(_moa_kernel, num_heads=num_heads, scale=scale)

    # Weights: constant block index => DMA'd once, VMEM-resident across batches.
    resident3 = lambda b: (0, 0, 0)
    per_batch = lambda b: (b, 0, 0)

    grid_spec = pltpu.PrefetchScalarGridSpec(
        num_scalar_prefetch=0,
        grid=(B,),
        in_specs=[
            pl.BlockSpec((1, L, D), per_batch),              # x (bf16)
            pl.BlockSpec((NUM_ORDERS, L, L), resident3),     # perm matrices (bf16)
            pl.BlockSpec((NUM_ORDERS, D, Do), resident3),    # order_w (bf16)
            pl.BlockSpec((NUM_ORDERS, 1, Do), resident3),    # order_b (f32)
            pl.BlockSpec((NUM_ORDERS, Do, Do), resident3),   # q_w
            pl.BlockSpec((NUM_ORDERS, 1, Do), resident3),    # q_b
            pl.BlockSpec((NUM_ORDERS, Do, Do), resident3),   # k_w
            pl.BlockSpec((NUM_ORDERS, 1, Do), resident3),    # k_b
            pl.BlockSpec((NUM_ORDERS, Do, Do), resident3),   # v_w
            pl.BlockSpec((NUM_ORDERS, 1, Do), resident3),    # v_b
            pl.BlockSpec((NUM_ORDERS, Do, Do), resident3),   # attn o_w
            pl.BlockSpec((NUM_ORDERS, 1, Do), resident3),    # attn o_b
            pl.BlockSpec((NUM_ORDERS, Do, D), resident3),    # out_nn weight slices
            pl.BlockSpec((1, D), lambda b: (0, 0)),          # out_nn bias (f32)
        ],
        out_specs=pl.BlockSpec((1, L, D), per_batch),
    )

    out = pl.pallas_call(
        kernel,
        out_shape=jax.ShapeDtypeStruct((B, L, D), jnp.float32),
        grid_spec=grid_spec,
        compiler_params=pltpu.CompilerParams(
            dimension_semantics=("parallel",),
            vmem_limit_bytes=48 * 1024 * 1024),
    )(x_bf, perm,
      params["order_w"], params["order_b"],
      params["q_w"], params["q_b"],
      params["k_w"], params["k_b"],
      params["v_w"], params["v_b"],
      params["p_w"], params["p_b"],
      params["out_w_split"], params["out_b"])
    return out, 0


# ----------------------- pure-JAX reference (for checking) -------------------
def _mha_ref(x, qw, qb, kw, kb, vw, vb, pw, pb, num_heads):
    b, l, d = x.shape
    hd = d // num_heads
    q = x @ qw + qb
    k = x @ kw + kb
    v = x @ vw + vb
    split = lambda t: t.reshape(b, l, num_heads, hd).transpose(0, 2, 1, 3)
    q, k, v = split(q), split(k), split(v)
    dots = jnp.einsum('bhid,bhjd->bhij', q, k) * (d ** -0.5)
    attn = jax.nn.softmax(dots, axis=-1)
    o = jnp.einsum('bhij,bhjd->bhid', attn, v)
    o = o.transpose(0, 2, 1, 3).reshape(b, l, d)
    return o @ pw + pb


def moa_reference(x, params, num_heads):
    B, L, D = x.shape
    f32 = lambda t: t.astype(jnp.float32)
    idxs = _perm_indices(L)
    xs = [x[:, jnp.asarray(idx)] for idx in idxs]
    ys = []
    for o in range(NUM_ORDERS):
        yo = xs[o] @ f32(params["order_w"][o]) + params["order_b"][o, 0]
        yo = _mha_ref(yo,
                      f32(params["q_w"][o]), params["q_b"][o, 0],
                      f32(params["k_w"][o]), params["k_b"][o, 0],
                      f32(params["v_w"][o]), params["v_b"][o, 0],
                      f32(params["p_w"][o]), params["p_b"][o, 0],
                      num_heads)
        ys.append(yo)
    cat = jnp.concatenate(ys, axis=-1)
    out_w = f32(params["out_w_split"]).reshape(D, D)
    return cat @ out_w + params["out_b"][0]


# ----------------------------- parameter init --------------------------------
def _xavier(key, shape):
    fan_in, fan_out = shape[-2], shape[-1]
    a = (6.0 / (fan_in + fan_out)) ** 0.5
    return jax.random.uniform(key, shape, jnp.float32, -a, a)


def init_params(key, dim, num_orders):
    Do = dim // num_orders
    ks = jax.random.split(key, 8)
    bf16 = jnp.bfloat16
    params = {
        # order{1..4}_nn (stacked); default-Linear-style small random biases
        "order_w": _xavier(ks[0], (num_orders, dim, Do)).astype(bf16),
        "order_b": 0.01 * jax.random.normal(ks[1], (num_orders, 1, Do), jnp.float32),
        # MHA q/k/v/o: xavier weights (bf16), zero biases (per init_layers)
        "q_w": _xavier(ks[2], (num_orders, Do, Do)).astype(bf16),
        "q_b": jnp.zeros((num_orders, 1, Do), jnp.float32),
        "k_w": _xavier(ks[3], (num_orders, Do, Do)).astype(bf16),
        "k_b": jnp.zeros((num_orders, 1, Do), jnp.float32),
        "v_w": _xavier(ks[4], (num_orders, Do, Do)).astype(bf16),
        "v_b": jnp.zeros((num_orders, 1, Do), jnp.float32),
        "p_w": _xavier(ks[5], (num_orders, Do, Do)).astype(bf16),
        "p_b": jnp.zeros((num_orders, 1, Do), jnp.float32),
        # out_nn: (D, D) in (in,out) layout, split per order along "in"
        "out_w_split": _xavier(ks[6], (dim, dim)).reshape(num_orders, Do, dim).astype(bf16),
        "out_b": 0.01 * jax.random.normal(ks[7], (1, dim), jnp.float32),
    }
    return params


if __name__ == "__main__":
    B, L, D = 2, 16, 32          # L must be a perfect square (4x4 patches)
    num_heads = 2                # heads over dim//num_orders = 8  -> head_dim 4
    # NOTE: real deployments should size Do / head_dim to multiples of 128 for
    # lane-dense MXU tiles; this toy config only exercises correctness.

    key = jax.random.PRNGKey(0)
    kx, kp = jax.random.split(key)
    x = jax.random.normal(kx, (B, L, D), jnp.float32)
    params = init_params(kp, D, NUM_ORDERS)

    out, _ = multi_ordered_attention(x, params, num_heads)
    out = jax.block_until_ready(out)

    # reference: same (bf16-rounded) weights/input, f32 math throughout
    x_ref_in = x.astype(jnp.bfloat16).astype(jnp.float32)
    ref = jax.block_until_ready(moa_reference(x_ref_in, params, num_heads))
    np.testing.assert_allclose(np.asarray(out), np.asarray(ref),
                               rtol=5e-2, atol=5e-2)
    print("KERNEL_OK")
</pallas_src>

<mosaic_0001>
module attributes {stable_mosaic.version = 11 : i64} {
  func.func @_moa_kernel(%arg0: i32, %arg1: memref<1x16x32xbf16, #tpu.memory_space<vmem>>, %arg2: memref<4x16x16xbf16, #tpu.memory_space<vmem>>, %arg3: memref<4x32x8xbf16, #tpu.memory_space<vmem>>, %arg4: memref<4x1x8xf32, #tpu.memory_space<vmem>>, %arg5: memref<4x8x8xbf16, #tpu.memory_space<vmem>>, %arg6: memref<4x1x8xf32, #tpu.memory_space<vmem>>, %arg7: memref<4x8x8xbf16, #tpu.memory_space<vmem>>, %arg8: memref<4x1x8xf32, #tpu.memory_space<vmem>>, %arg9: memref<4x8x8xbf16, #tpu.memory_space<vmem>>, %arg10: memref<4x1x8xf32, #tpu.memory_space<vmem>>, %arg11: memref<4x8x8xbf16, #tpu.memory_space<vmem>>, %arg12: memref<4x1x8xf32, #tpu.memory_space<vmem>>, %arg13: memref<4x8x32xbf16, #tpu.memory_space<vmem>>, %arg14: memref<1x32xf32, #tpu.memory_space<vmem>>, %arg15: memref<1x16x32xf32, #tpu.memory_space<vmem>>) attributes {dimension_semantics = [#tpu.dimension_semantics<parallel>], iteration_bounds = array<i64: 2>, scalar_prefetch = 0 : i64, scratch_operands = 0 : i64, tpu.core_type = #tpu.core_type<tc>, window_params = [{transform_indices = @transform_0, window_bounds = array<i64: 1, 16, 32>}, {pipeline_mode = #tpu.pipeline_mode<synchronous>, transform_indices = @transform_1, window_bounds = array<i64: 4, 16, 16>}, {pipeline_mode = #tpu.pipeline_mode<synchronous>, transform_indices = @transform_2, window_bounds = array<i64: 4, 32, 8>}, {pipeline_mode = #tpu.pipeline_mode<synchronous>, transform_indices = @transform_3, window_bounds = array<i64: 4, 1, 8>}, {pipeline_mode = #tpu.pipeline_mode<synchronous>, transform_indices = @transform_4, window_bounds = array<i64: 4, 8, 8>}, {pipeline_mode = #tpu.pipeline_mode<synchronous>, transform_indices = @transform_5, window_bounds = array<i64: 4, 1, 8>}, {pipeline_mode = #tpu.pipeline_mode<synchronous>, transform_indices = @transform_6, window_bounds = array<i64: 4, 8, 8>}, {pipeline_mode = #tpu.pipeline_mode<synchronous>, transform_indices = @transform_7, window_bounds = array<i64: 4, 1, 8>}, {pipeline_mode = #tpu.pipeline_mode<synchronous>, transform_indices = @transform_8, window_bounds = array<i64: 4, 8, 8>}, {pipeline_mode = #tpu.pipeline_mode<synchronous>, transform_indices = @transform_9, window_bounds = array<i64: 4, 1, 8>}, {pipeline_mode = #tpu.pipeline_mode<synchronous>, transform_indices = @transform_10, window_bounds = array<i64: 4, 8, 8>}, {pipeline_mode = #tpu.pipeline_mode<synchronous>, transform_indices = @transform_11, window_bounds = array<i64: 4, 1, 8>}, {pipeline_mode = #tpu.pipeline_mode<synchronous>, transform_indices = @transform_12, window_bounds = array<i64: 4, 8, 32>}, {pipeline_mode = #tpu.pipeline_mode<synchronous>, transform_indices = @transform_13, window_bounds = array<i64: 1, 32>}, {transform_indices = @transform_14, window_bounds = array<i64: 1, 16, 32>}]} {
    %c0 = arith.constant 0 : index
    %c0_0 = arith.constant 0 : index
    %c0_1 = arith.constant 0 : index
    %0 = vector.load %arg1[%c0, %c0_0, %c0_1] : memref<1x16x32xbf16, #tpu.memory_space<vmem>>, vector<1x16x32xbf16>
    %1 = vector.shape_cast %0 : vector<1x16x32xbf16> to vector<16x32xbf16>
    %cst = arith.constant 0.000000e+00 : f32
    %2 = vector.broadcast %cst : f32 to vector<16x32xf32>
    %c0_2 = arith.constant 0 : index
    %c0_3 = arith.constant 0 : index
    %c0_4 = arith.constant 0 : index
    %3 = vector.load %arg3[%c0_2, %c0_3, %c0_4] : memref<4x32x8xbf16, #tpu.memory_space<vmem>>, vector<1x32x8xbf16>
    %4 = vector.shape_cast %3 : vector<1x32x8xbf16> to vector<32x8xbf16>
    %cst_5 = arith.constant dense<0.000000e+00> : vector<16x8xf32>
    %5 = tpu.matmul %1, %4, %cst_5 {dimension_numbers = #tpu.dot_dimension_numbers<[1], [0], [0], [1], [0, 0, 1, 1], [], []>} : vector<16x32xbf16>, vector<32x8xbf16>, vector<16x8xf32> -> vector<16x8xf32>
    %c0_6 = arith.constant 0 : index
    %c0_7 = arith.constant 0 : index
    %c0_8 = arith.constant 0 : index
    %6 = vector.load %arg4[%c0_6, %c0_7, %c0_8] : memref<4x1x8xf32, #tpu.memory_space<vmem>>, vector<1x1x8xf32>
    %7 = vector.shape_cast %6 : vector<1x1x8xf32> to vector<1x8xf32>
    %8 = vector.broadcast %7 : vector<1x8xf32> to vector<16x8xf32>
    %9 = arith.addf %5, %8 : vector<16x8xf32>
    %10 = arith.truncf %9 : vector<16x8xf32> to vector<16x8xbf16>
    %c0_9 = arith.constant 0 : index
    %c0_10 = arith.constant 0 : index
    %c0_11 = arith.constant 0 : index
    %11 = vector.load %arg5[%c0_9, %c0_10, %c0_11] : memref<4x8x8xbf16, #tpu.memory_space<vmem>>, vector<1x8x8xbf16>
    %12 = vector.shape_cast %11 : vector<1x8x8xbf16> to vector<8x8xbf16>
    %cst_12 = arith.constant dense<0.000000e+00> : vector<16x8xf32>
    %13 = tpu.matmul %10, %12, %cst_12 {dimension_numbers = #tpu.dot_dimension_numbers<[1], [0], [0], [1], [0, 0, 1, 1], [], []>} : vector<16x8xbf16>, vector<8x8xbf16>, vector<16x8xf32> -> vector<16x8xf32>
    %c0_13 = arith.constant 0 : index
    %c0_14 = arith.constant 0 : index
    %c0_15 = arith.constant 0 : index
    %14 = vector.load %arg6[%c0_13, %c0_14, %c0_15] : memref<4x1x8xf32, #tpu.memory_space<vmem>>, vector<1x1x8xf32>
    %15 = vector.shape_cast %14 : vector<1x1x8xf32> to vector<1x8xf32>
    %16 = vector.broadcast %15 : vector<1x8xf32> to vector<16x8xf32>
    %17 = arith.addf %13, %16 : vector<16x8xf32>
    %c0_16 = arith.constant 0 : index
    %c0_17 = arith.constant 0 : index
    %c0_18 = arith.constant 0 : index
    %18 = vector.load %arg7[%c0_16, %c0_17, %c0_18] : memref<4x8x8xbf16, #tpu.memory_space<vmem>>, vector<1x8x8xbf16>
    %19 = vector.shape_cast %18 : vector<1x8x8xbf16> to vector<8x8xbf16>
    %cst_19 = arith.constant dense<0.000000e+00> : vector<16x8xf32>
    %20 = tpu.matmul %10, %19, %cst_19 {dimension_numbers = #tpu.dot_dimension_numbers<[1], [0], [0], [1], [0, 0, 1, 1], [], []>} : vector<16x8xbf16>, vector<8x8xbf16>, vector<16x8xf32> -> vector<16x8xf32>
    %c0_20 = arith.constant 0 : index
    %c0_21 = arith.constant 0 : index
    %c0_22 = arith.constant 0 : index
    %21 = vector.load %arg8[%c0_20, %c0_21, %c0_22] : memref<4x1x8xf32, #tpu.memory_space<vmem>>, vector<1x1x8xf32>
    %22 = vector.shape_cast %21 : vector<1x1x8xf32> to vector<1x8xf32>
    %23 = vector.broadcast %22 : vector<1x8xf32> to vector<16x8xf32>
    %24 = arith.addf %20, %23 : vector<16x8xf32>
    %c0_23 = arith.constant 0 : index
    %c0_24 = arith.constant 0 : index
    %c0_25 = arith.constant 0 : index
    %25 = vector.load %arg9[%c0_23, %c0_24, %c0_25] : memref<4x8x8xbf16, #tpu.memory_space<vmem>>, vector<1x8x8xbf16>
    %26 = vector.shape_cast %25 : vector<1x8x8xbf16> to vector<8x8xbf16>
    %cst_26 = arith.constant dense<0.000000e+00> : vector<16x8xf32>
    %27 = tpu.matmul %10, %26, %cst_26 {dimension_numbers = #tpu.dot_dimension_numbers<[1], [0], [0], [1], [0, 0, 1, 1], [], []>} : vector<16x8xbf16>, vector<8x8xbf16>, vector<16x8xf32> -> vector<16x8xf32>
    %c0_27 = arith.constant 0 : index
    %c0_28 = arith.constant 0 : index
    %c0_29 = arith.constant 0 : index
    %28 = vector.load %arg10[%c0_27, %c0_28, %c0_29] : memref<4x1x8xf32, #tpu.memory_space<vmem>>, vector<1x1x8xf32>
    %29 = vector.shape_cast %28 : vector<1x1x8xf32> to vector<1x8xf32>
    %30 = vector.broadcast %29 : vector<1x8xf32> to vector<16x8xf32>
    %31 = arith.addf %27, %30 : vector<16x8xf32>
    %cst_30 = arith.constant 0.353553385 : f32
    %32 = vector.broadcast %cst_30 : f32 to vector<16x8xf32>
    %33 = arith.mulf %17, %32 : vector<16x8xf32>
    %34 = arith.truncf %33 : vector<16x8xf32> to vector<16x8xbf16>
    %35 = arith.truncf %24 : vector<16x8xf32> to vector<16x8xbf16>
    %36 = arith.truncf %31 : vector<16x8xf32> to vector<16x8xbf16>
    %c0_31 = arith.constant 0 : index
    %c0_32 = arith.constant 0 : index
    %c0_33 = arith.constant 0 : index
    %37 = vector.load %arg11[%c0_31, %c0_32, %c0_33] : memref<4x8x8xbf16, #tpu.memory_space<vmem>>, vector<1x8x8xbf16>
    %38 = vector.shape_cast %37 : vector<1x8x8xbf16> to vector<8x8xbf16>
    %cst_34 = arith.constant 0.000000e+00 : f32
    %39 = vector.broadcast %cst_34 : f32 to vector<16x8xf32>
    %40 = vector.extract_strided_slice %34 {offsets = [0, 0], sizes = [16, 4], strides = [1, 1]} : vector<16x8xbf16> to vector<16x4xbf16>
    %41 = vector.extract_strided_slice %35 {offsets = [0, 0], sizes = [16, 4], strides = [1, 1]} : vector<16x8xbf16> to vector<16x4xbf16>
    %cst_35 = arith.constant dense<0.000000e+00> : vector<16x16xf32>
    %42 = tpu.matmul %40, %41, %cst_35 {dimension_numbers = #tpu.dot_dimension_numbers<[1], [1], [0], [0], [0, 0, 1, 0], [], []>} : vector<16x4xbf16>, vector<16x4xbf16>, vector<16x16xf32> -> vector<16x16xf32>
    %cst_36 = arith.constant dense<0xFF800000> : vector<16xf32>
    %43 = vector.multi_reduction <maximumf>, %42, %cst_36 [1] : vector<16x16xf32> to vector<16xf32>
    %44 = vector.shape_cast %43 : vector<16xf32> to vector<16x1xf32>
    %45 = vector.broadcast %44 : vector<16x1xf32> to vector<16x16xf32>
    %46 = arith.subf %42, %45 : vector<16x16xf32>
    %47 = math.exp %46 : vector<16x16xf32>
    %cst_37 = arith.constant dense<0.000000e+00> : vector<16xf32>
    %48 = vector.multi_reduction <add>, %47, %cst_37 [1] : vector<16x16xf32> to vector<16xf32>
    %49 = vector.shape_cast %48 : vector<16xf32> to vector<16x1xf32>
    %50 = tpu.reciprocal %49 {approx = true} : vector<16x1xf32> -> vector<16x1xf32>
    %51 = vector.broadcast %50 : vector<16x1xf32> to vector<16x16xf32>
    %52 = arith.mulf %47, %51 : vector<16x16xf32>
    %53 = arith.truncf %52 : vector<16x16xf32> to vector<16x16xbf16>
    %54 = vector.extract_strided_slice %36 {offsets = [0, 0], sizes = [16, 4], strides = [1, 1]} : vector<16x8xbf16> to vector<16x4xbf16>
    %cst_38 = arith.constant dense<0.000000e+00> : vector<16x4xf32>
    %55 = tpu.matmul %53, %54, %cst_38 {dimension_numbers = #tpu.dot_dimension_numbers<[1], [0], [0], [1], [0, 0, 1, 1], [], []>} : vector<16x16xbf16>, vector<16x4xbf16>, vector<16x4xf32> -> vector<16x4xf32>
    %56 = arith.truncf %55 : vector<16x4xf32> to vector<16x4xbf16>
    %57 = vector.extract_strided_slice %38 {offsets = [0, 0], sizes = [4, 8], strides = [1, 1]} : vector<8x8xbf16> to vector<4x8xbf16>
    %cst_39 = arith.constant dense<0.000000e+00> : vector<16x8xf32>
    %58 = tpu.matmul %56, %57, %cst_39 {dimension_numbers = #tpu.dot_dimension_numbers<[1], [0], [0], [1], [0, 0, 1, 1], [], []>} : vector<16x4xbf16>, vector<4x8xbf16>, vector<16x8xf32> -> vector<16x8xf32>
    %59 = arith.addf %39, %58 : vector<16x8xf32>
    %60 = vector.extract_strided_slice %34 {offsets = [0, 4], sizes = [16, 4], strides = [1, 1]} : vector<16x8xbf16> to vector<16x4xbf16>
    %61 = vector.extract_strided_slice %35 {offsets = [0, 4], sizes = [16, 4], strides = [1, 1]} : vector<16x8xbf16> to vector<16x4xbf16>
    %cst_40 = arith.constant dense<0.000000e+00> : vector<16x16xf32>
    %62 = tpu.matmul %60, %61, %cst_40 {dimension_numbers = #tpu.dot_dimension_numbers<[1], [1], [0], [0], [0, 0, 1, 0], [], []>} : vector<16x4xbf16>, vector<16x4xbf16>, vector<16x16xf32> -> vector<16x16xf32>
    %cst_41 = arith.constant dense<0xFF800000> : vector<16xf32>
    %63 = vector.multi_reduction <maximumf>, %62, %cst_41 [1] : vector<16x16xf32> to vector<16xf32>
    %64 = vector.shape_cast %63 : vector<16xf32> to vector<16x1xf32>
    %65 = vector.broadcast %64 : vector<16x1xf32> to vector<16x16xf32>
    %66 = arith.subf %62, %65 : vector<16x16xf32>
    %67 = math.exp %66 : vector<16x16xf32>
    %cst_42 = arith.constant dense<0.000000e+00> : vector<16xf32>
    %68 = vector.multi_reduction <add>, %67, %cst_42 [1] : vector<16x16xf32> to vector<16xf32>
    %69 = vector.shape_cast %68 : vector<16xf32> to vector<16x1xf32>
    %70 = tpu.reciprocal %69 {approx = true} : vector<16x1xf32> -> vector<16x1xf32>
    %71 = vector.broadcast %70 : vector<16x1xf32> to vector<16x16xf32>
    %72 = arith.mulf %67, %71 : vector<16x16xf32>
    %73 = arith.truncf %72 : vector<16x16xf32> to vector<16x16xbf16>
    %74 = vector.extract_strided_slice %36 {offsets = [0, 4], sizes = [16, 4], strides = [1, 1]} : vector<16x8xbf16> to vector<16x4xbf16>
    %cst_43 = arith.constant dense<0.000000e+00> : vector<16x4xf32>
    %75 = tpu.matmul %73, %74, %cst_43 {dimension_numbers = #tpu.dot_dimension_numbers<[1], [0], [0], [1], [0, 0, 1, 1], [], []>} : vector<16x16xbf16>, vector<16x4xbf16>, vector<16x4xf32> -> vector<16x4xf32>
    %76 = arith.truncf %75 : vector<16x4xf32> to vector<16x4xbf16>
    %77 = vector.extract_strided_slice %38 {offsets = [4, 0], sizes = [4, 8], strides = [1, 1]} : vector<8x8xbf16> to vector<4x8xbf16>
    %cst_44 = arith.constant dense<0.000000e+00> : vector<16x8xf32>
    %78 = tpu.matmul %76, %77, %cst_44 {dimension_numbers = #tpu.dot_dimension_numbers<[1], [0], [0], [1], [0, 0, 1, 1], [], []>} : vector<16x4xbf16>, vector<4x8xbf16>, vector<16x8xf32> -> vector<16x8xf32>
    %79 = arith.addf %59, %78 : vector<16x8xf32>
    %c0_45 = arith.constant 0 : index
    %c0_46 = arith.constant 0 : index
    %c0_47 = arith.constant 0 : index
    %80 = vector.load %arg12[%c0_45, %c0_46, %c0_47] : memref<4x1x8xf32, #tpu.memory_space<vmem>>, vector<1x1x8xf32>
    %81 = vector.shape_cast %80 : vector<1x1x8xf32> to vector<1x8xf32>
    %82 = vector.broadcast %81 : vector<1x8xf32> to vector<16x8xf32>
    %83 = arith.addf %79, %82 : vector<16x8xf32>
    %84 = arith.truncf %83 : vector<16x8xf32> to vector<16x8xbf16>
    %c0_48 = arith.constant 0 : index
    %c0_49 = arith.constant 0 : index
    %c0_50 = arith.constant 0 : index
    %85 = vector.load %arg13[%c0_48, %c0_49, %c0_50] : memref<4x8x32xbf16, #tpu.memory_space<vmem>>, vector<1x8x32xbf16>
    %86 = vector.shape_cast %85 : vector<1x8x32xbf16> to vector<8x32xbf16>
    %cst_51 = arith.constant dense<0.000000e+00> : vector<16x32xf32>
    %87 = tpu.matmul %84, %86, %cst_51 {dimension_numbers = #tpu.dot_dimension_numbers<[1], [0], [0], [1], [0, 0, 1, 1], [], []>} : vector<16x8xbf16>, vector<8x32xbf16>, vector<16x32xf32> -> vector<16x32xf32>
    %88 = arith.addf %2, %87 : vector<16x32xf32>
    %c1 = arith.constant 1 : index
    %c0_52 = arith.constant 0 : index
    %c0_53 = arith.constant 0 : index
    %89 = vector.load %arg3[%c1, %c0_52, %c0_53] : memref<4x32x8xbf16, #tpu.memory_space<vmem>>, vector<1x32x8xbf16>
    %90 = vector.shape_cast %89 : vector<1x32x8xbf16> to vector<32x8xbf16>
    %cst_54 = arith.constant dense<0.000000e+00> : vector<16x8xf32>
    %91 = tpu.matmul %1, %90, %cst_54 {dimension_numbers = #tpu.dot_dimension_numbers<[1], [0], [0], [1], [0, 0, 1, 1], [], []>} : vector<16x32xbf16>, vector<32x8xbf16>, vector<16x8xf32> -> vector<16x8xf32>
    %c1_55 = arith.constant 1 : index
    %c0_56 = arith.constant 0 : index
    %c0_57 = arith.constant 0 : index
    %92 = vector.load %arg2[%c1_55, %c0_56, %c0_57] : memref<4x16x16xbf16, #tpu.memory_space<vmem>>, vector<1x16x16xbf16>
    %93 = vector.shape_cast %92 : vector<1x16x16xbf16> to vector<16x16xbf16>
    %94 = arith.truncf %91 : vector<16x8xf32> to vector<16x8xbf16>
    %cst_58 = arith.constant dense<0.000000e+00> : vector<16x8xf32>
    %95 = tpu.matmul %93, %94, %cst_58 {dimension_numbers = #tpu.dot_dimension_numbers<[1], [0], [0], [1], [0, 0, 1, 1], [], []>} : vector<16x16xbf16>, vector<16x8xbf16>, vector<16x8xf32> -> vector<16x8xf32>
    %c1_59 = arith.constant 1 : index
    %c0_60 = arith.constant 0 : index
    %c0_61 = arith.constant 0 : index
    %96 = vector.load %arg4[%c1_59, %c0_60, %c0_61] : memref<4x1x8xf32, #tpu.memory_space<vmem>>, vector<1x1x8xf32>
    %97 = vector.shape_cast %96 : vector<1x1x8xf32> to vector<1x8xf32>
    %98 = vector.broadcast %97 : vector<1x8xf32> to vector<16x8xf32>
    %99 = arith.addf %95, %98 : vector<16x8xf32>
    %100 = arith.truncf %99 : vector<16x8xf32> to vector<16x8xbf16>
    %c1_62 = arith.constant 1 : index
    %c0_63 = arith.constant 0 : index
    %c0_64 = arith.constant 0 : index
    %101 = vector.load %arg5[%c1_62, %c0_63, %c0_64] : memref<4x8x8xbf16, #tpu.memory_space<vmem>>, vector<1x8x8xbf16>
    %102 = vector.shape_cast %101 : vector<1x8x8xbf16> to vector<8x8xbf16>
    %cst_65 = arith.constant dense<0.000000e+00> : vector<16x8xf32>
    %103 = tpu.matmul %100, %102, %cst_65 {dimension_numbers = #tpu.dot_dimension_numbers<[1], [0], [0], [1], [0, 0, 1, 1], [], []>} : vector<16x8xbf16>, vector<8x8xbf16>, vector<16x8xf32> -> vector<16x8xf32>
    %c1_66 = arith.constant 1 : index
    %c0_67 = arith.constant 0 : index
    %c0_68 = arith.constant 0 : index
    %104 = vector.load %arg6[%c1_66, %c0_67, %c0_68] : memref<4x1x8xf32, #tpu.memory_space<vmem>>, vector<1x1x8xf32>
    %105 = vector.shape_cast %104 : vector<1x1x8xf32> to vector<1x8xf32>
    %106 = vector.broadcast %105 : vector<1x8xf32> to vector<16x8xf32>
    %107 = arith.addf %103, %106 : vector<16x8xf32>
    %c1_69 = arith.constant 1 : index
    %c0_70 = arith.constant 0 : index
    %c0_71 = arith.constant 0 : index
    %108 = vector.load %arg7[%c1_69, %c0_70, %c0_71] : memref<4x8x8xbf16, #tpu.memory_space<vmem>>, vector<1x8x8xbf16>
    %109 = vector.shape_cast %108 : vector<1x8x8xbf16> to vector<8x8xbf16>
    %cst_72 = arith.constant dense<0.000000e+00> : vector<16x8xf32>
    %110 = tpu.matmul %100, %109, %cst_72 {dimension_numbers = #tpu.dot_dimension_numbers<[1], [0], [0], [1], [0, 0, 1, 1], [], []>} : vector<16x8xbf16>, vector<8x8xbf16>, vector<16x8xf32> -> vector<16x8xf32>
    %c1_73 = arith.constant 1 : index
    %c0_74 = arith.constant 0 : index
    %c0_75 = arith.constant 0 : index
    %111 = vector.load %arg8[%c1_73, %c0_74, %c0_75] : memref<4x1x8xf32, #tpu.memory_space<vmem>>, vector<1x1x8xf32>
    %112 = vector.shape_cast %111 : vector<1x1x8xf32> to vector<1x8xf32>
    %113 = vector.broadcast %112 : vector<1x8xf32> to vector<16x8xf32>
    %114 = arith.addf %110, %113 : vector<16x8xf32>
    %c1_76 = arith.constant 1 : index
    %c0_77 = arith.constant 0 : index
    %c0_78 = arith.constant 0 : index
    %115 = vector.load %arg9[%c1_76, %c0_77, %c0_78] : memref<4x8x8xbf16, #tpu.memory_space<vmem>>, vector<1x8x8xbf16>
    %116 = vector.shape_cast %115 : vector<1x8x8xbf16> to vector<8x8xbf16>
    %cst_79 = arith.constant dense<0.000000e+00> : vector<16x8xf32>
    %117 = tpu.matmul %100, %116, %cst_79 {dimension_numbers = #tpu.dot_dimension_numbers<[1], [0], [0], [1], [0, 0, 1, 1], [], []>} : vector<16x8xbf16>, vector<8x8xbf16>, vector<16x8xf32> -> vector<16x8xf32>
    %c1_80 = arith.constant 1 : index
    %c0_81 = arith.constant 0 : index
    %c0_82 = arith.constant 0 : index
    %118 = vector.load %arg10[%c1_80, %c0_81, %c0_82] : memref<4x1x8xf32, #tpu.memory_space<vmem>>, vector<1x1x8xf32>
    %119 = vector.shape_cast %118 : vector<1x1x8xf32> to vector<1x8xf32>
    %120 = vector.broadcast %119 : vector<1x8xf32> to vector<16x8xf32>
    %121 = arith.addf %117, %120 : vector<16x8xf32>
    %cst_83 = arith.constant 0.353553385 : f32
    %122 = vector.broadcast %cst_83 : f32 to vector<16x8xf32>
    %123 = arith.mulf %107, %122 : vector<16x8xf32>
    %124 = arith.truncf %123 : vector<16x8xf32> to vector<16x8xbf16>
    %125 = arith.truncf %114 : vector<16x8xf32> to vector<16x8xbf16>
    %126 = arith.truncf %121 : vector<16x8xf32> to vector<16x8xbf16>
    %c1_84 = arith.constant 1 : index
    %c0_85 = arith.constant 0 : index
    %c0_86 = arith.constant 0 : index
    %127 = vector.load %arg11[%c1_84, %c0_85, %c0_86] : memref<4x8x8xbf16, #tpu.memory_space<vmem>>, vector<1x8x8xbf16>
    %128 = vector.shape_cast %127 : vector<1x8x8xbf16> to vector<8x8xbf16>
    %cst_87 = arith.constant 0.000000e+00 : f32
    %129 = vector.broadcast %cst_87 : f32 to vector<16x8xf32>
    %130 = vector.extract_strided_slice %124 {offsets = [0, 0], sizes = [16, 4], strides = [1, 1]} : vector<16x8xbf16> to vector<16x4xbf16>
    %131 = vector.extract_strided_slice %125 {offsets = [0, 0], sizes = [16, 4], strides = [1, 1]} : vector<16x8xbf16> to vector<16x4xbf16>
    %cst_88 = arith.constant dense<0.000000e+00> : vector<16x16xf32>
    %132 = tpu.matmul %130, %131, %cst_88 {dimension_numbers = #tpu.dot_dimension_numbers<[1], [1], [0], [0], [0, 0, 1, 0], [], []>} : vector<16x4xbf16>, vector<16x4xbf16>, vector<16x16xf32> -> vector<16x16xf32>
    %cst_89 = arith.constant dense<0xFF800000> : vector<16xf32>
    %133 = vector.multi_reduction <maximumf>, %132, %cst_89 [1] : vector<16x16xf32> to vector<16xf32>
    %134 = vector.shape_cast %133 : vector<16xf32> to vector<16x1xf32>
    %135 = vector.broadcast %134 : vector<16x1xf32> to vector<16x16xf32>
    %136 = arith.subf %132, %135 : vector<16x16xf32>
    %137 = math.exp %136 : vector<16x16xf32>
    %cst_90 = arith.constant dense<0.000000e+00> : vector<16xf32>
    %138 = vector.multi_reduction <add>, %137, %cst_90 [1] : vector<16x16xf32> to vector<16xf32>
    %139 = vector.shape_cast %138 : vector<16xf32> to vector<16x1xf32>
    %140 = tpu.reciprocal %139 {approx = true} : vector<16x1xf32> -> vector<16x1xf32>
    %141 = vector.broadcast %140 : vector<16x1xf32> to vector<16x16xf32>
    %142 = arith.mulf %137, %141 : vector<16x16xf32>
    %143 = arith.truncf %142 : vector<16x16xf32> to vector<16x16xbf16>
    %144 = vector.extract_strided_slice %126 {offsets = [0, 0], sizes = [16, 4], strides = [1, 1]} : vector<16x8xbf16> to vector<16x4xbf16>
    %cst_91 = arith.constant dense<0.000000e+00> : vector<16x4xf32>
    %145 = tpu.matmul %143, %144, %cst_91 {dimension_numbers = #tpu.dot_dimension_numbers<[1], [0], [0], [1], [0, 0, 1, 1], [], []>} : vector<16x16xbf16>, vector<16x4xbf16>, vector<16x4xf32> -> vector<16x4xf32>
    %146 = arith.truncf %145 : vector<16x4xf32> to vector<16x4xbf16>
    %147 = vector.extract_strided_slice %128 {offsets = [0, 0], sizes = [4, 8], strides = [1, 1]} : vector<8x8xbf16> to vector<4x8xbf16>
    %cst_92 = arith.constant dense<0.000000e+00> : vector<16x8xf32>
    %148 = tpu.matmul %146, %147, %cst_92 {dimension_numbers = #tpu.dot_dimension_numbers<[1], [0], [0], [1], [0, 0, 1, 1], [], []>} : vector<16x4xbf16>, vector<4x8xbf16>, vector<16x8xf32> -> vector<16x8xf32>
    %149 = arith.addf %129, %148 : vector<16x8xf32>
    %150 = vector.extract_strided_slice %124 {offsets = [0, 4], sizes = [16, 4], strides = [1, 1]} : vector<16x8xbf16> to vector<16x4xbf16>
    %151 = vector.extract_strided_slice %125 {offsets = [0, 4], sizes = [16, 4], strides = [1, 1]} : vector<16x8xbf16> to vector<16x4xbf16>
    %cst_93 = arith.constant dense<0.000000e+00> : vector<16x16xf32>
    %152 = tpu.matmul %150, %151, %cst_93 {dimension_numbers = #tpu.dot_dimension_numbers<[1], [1], [0], [0], [0, 0, 1, 0], [], []>} : vector<16x4xbf16>, vector<16x4xbf16>, vector<16x16xf32> -> vector<16x16xf32>
    %cst_94 = arith.constant dense<0xFF800000> : vector<16xf32>
    %153 = vector.multi_reduction <maximumf>, %152, %cst_94 [1] : vector<16x16xf32> to vector<16xf32>
    %154 = vector.shape_cast %153 : vector<16xf32> to vector<16x1xf32>
    %155 = vector.broadcast %154 : vector<16x1xf32> to vector<16x16xf32>
    %156 = arith.subf %152, %155 : vector<16x16xf32>
    %157 = math.exp %156 : vector<16x16xf32>
    %cst_95 = arith.constant dense<0.000000e+00> : vector<16xf32>
    %158 = vector.multi_reduction <add>, %157, %cst_95 [1] : vector<16x16xf32> to vector<16xf32>
    %159 = vector.shape_cast %158 : vector<16xf32> to vector<16x1xf32>
    %160 = tpu.reciprocal %159 {approx = true} : vector<16x1xf32> -> vector<16x1xf32>
    %161 = vector.broadcast %160 : vector<16x1xf32> to vector<16x16xf32>
    %162 = arith.mulf %157, %161 : vector<16x16xf32>
    %163 = arith.truncf %162 : vector<16x16xf32> to vector<16x16xbf16>
    %164 = vector.extract_strided_slice %126 {offsets = [0, 4], sizes = [16, 4], strides = [1, 1]} : vector<16x8xbf16> to vector<16x4xbf16>
    %cst_96 = arith.constant dense<0.000000e+00> : vector<16x4xf32>
    %165 = tpu.matmul %163, %164, %cst_96 {dimension_numbers = #tpu.dot_dimension_numbers<[1], [0], [0], [1], [0, 0, 1, 1], [], []>} : vector<16x16xbf16>, vector<16x4xbf16>, vector<16x4xf32> -> vector<16x4xf32>
    %166 = arith.truncf %165 : vector<16x4xf32> to vector<16x4xbf16>
    %167 = vector.extract_strided_slice %128 {offsets = [4, 0], sizes = [4, 8], strides = [1, 1]} : vector<8x8xbf16> to vector<4x8xbf16>
    %cst_97 = arith.constant dense<0.000000e+00> : vector<16x8xf32>
    %168 = tpu.matmul %166, %167, %cst_97 {dimension_numbers = #tpu.dot_dimension_numbers<[1], [0], [0], [1], [0, 0, 1, 1], [], []>} : vector<16x4xbf16>, vector<4x8xbf16>, vector<16x8xf32> -> vector<16x8xf32>
    %169 = arith.addf %149, %168 : vector<16x8xf32>
    %c1_98 = arith.constant 1 : index
    %c0_99 = arith.constant 0 : index
    %c0_100 = arith.constant 0 : index
    %170 = vector.load %arg12[%c1_98, %c0_99, %c0_100] : memref<4x1x8xf32, #tpu.memory_space<vmem>>, vector<1x1x8xf32>
    %171 = vector.shape_cast %170 : vector<1x1x8xf32> to vector<1x8xf32>
    %172 = vector.broadcast %171 : vector<1x8xf32> to vector<16x8xf32>
    %173 = arith.addf %169, %172 : vector<16x8xf32>
    %174 = arith.truncf %173 : vector<16x8xf32> to vector<16x8xbf16>
    %c1_101 = arith.constant 1 : index
    %c0_102 = arith.constant 0 : index
    %c0_103 = arith.constant 0 : index
    %175 = vector.load %arg13[%c1_101, %c0_102, %c0_103] : memref<4x8x32xbf16, #tpu.memory_space<vmem>>, vector<1x8x32xbf16>
    %176 = vector.shape_cast %175 : vector<1x8x32xbf16> to vector<8x32xbf16>
    %cst_104 = arith.constant dense<0.000000e+00> : vector<16x32xf32>
    %177 = tpu.matmul %174, %176, %cst_104 {dimension_numbers = #tpu.dot_dimension_numbers<[1], [0], [0], [1], [0, 0, 1, 1], [], []>} : vector<16x8xbf16>, vector<8x32xbf16>, vector<16x32xf32> -> vector<16x32xf32>
    %178 = arith.addf %88, %177 : vector<16x32xf32>
    %c2 = arith.constant 2 : index
    %c0_105 = arith.constant 0 : index
    %c0_106 = arith.constant 0 : index
    %179 = vector.load %arg3[%c2, %c0_105, %c0_106] : memref<4x32x8xbf16, #tpu.memory_space<vmem>>, vector<1x32x8xbf16>
    %180 = vector.shape_cast %179 : vector<1x32x8xbf16> to vector<32x8xbf16>
    %cst_107 = arith.constant dense<0.000000e+00> : vector<16x8xf32>
    %181 = tpu.matmul %1, %180, %cst_107 {dimension_numbers = #tpu.dot_dimension_numbers<[1], [0], [0], [1], [0, 0, 1, 1], [], []>} : vector<16x32xbf16>, vector<32x8xbf16>, vector<16x8xf32> -> vector<16x8xf32>
    %c2_108 = arith.constant 2 : index
    %c0_109 = arith.constant 0 : index
    %c0_110 = arith.constant 0 : index
    %182 = vector.load %arg2[%c2_108, %c0_109, %c0_110] : memref<4x16x16xbf16, #tpu.memory_space<vmem>>, vector<1x16x16xbf16>
    %183 = vector.shape_cast %182 : vector<1x16x16xbf16> to vector<16x16xbf16>
    %184 = arith.truncf %181 : vector<16x8xf32> to vector<16x8xbf16>
    %cst_111 = arith.constant dense<0.000000e+00> : vector<16x8xf32>
    %185 = tpu.matmul %183, %184, %cst_111 {dimension_numbers = #tpu.dot_dimension_numbers<[1], [0], [0], [1], [0, 0, 1, 1], [], []>} : vector<16x16xbf16>, vector<16x8xbf16>, vector<16x8xf32> -> vector<16x8xf32>
    %c2_112 = arith.constant 2 : index
    %c0_113 = arith.constant 0 : index
    %c0_114 = arith.constant 0 : index
    %186 = vector.load %arg4[%c2_112, %c0_113, %c0_114] : memref<4x1x8xf32, #tpu.memory_space<vmem>>, vector<1x1x8xf32>
    %187 = vector.shape_cast %186 : vector<1x1x8xf32> to vector<1x8xf32>
    %188 = vector.broadcast %187 : vector<1x8xf32> to vector<16x8xf32>
    %189 = arith.addf %185, %188 : vector<16x8xf32>
    %190 = arith.truncf %189 : vector<16x8xf32> to vector<16x8xbf16>
    %c2_115 = arith.constant 2 : index
    %c0_116 = arith.constant 0 : index
    %c0_117 = arith.constant 0 : index
    %191 = vector.load %arg5[%c2_115, %c0_116, %c0_117] : memref<4x8x8xbf16, #tpu.memory_space<vmem>>, vector<1x8x8xbf16>
    %192 = vector.shape_cast %191 : vector<1x8x8xbf16> to vector<8x8xbf16>
    %cst_118 = arith.constant dense<0.000000e+00> : vector<16x8xf32>
    %193 = tpu.matmul %190, %192, %cst_118 {dimension_numbers = #tpu.dot_dimension_numbers<[1], [0], [0], [1], [0, 0, 1, 1], [], []>} : vector<16x8xbf16>, vector<8x8xbf16>, vector<16x8xf32> -> vector<16x8xf32>
    %c2_119 = arith.constant 2 : index
    %c0_120 = arith.constant 0 : index
    %c0_121 = arith.constant 0 : index
    %194 = vector.load %arg6[%c2_119, %c0_120, %c0_121] : memref<4x1x8xf32, #tpu.memory_space<vmem>>, vector<1x1x8xf32>
    %195 = vector.shape_cast %194 : vector<1x1x8xf32> to vector<1x8xf32>
    %196 = vector.broadcast %195 : vector<1x8xf32> to vector<16x8xf32>
    %197 = arith.addf %193, %196 : vector<16x8xf32>
    %c2_122 = arith.constant 2 : index
    %c0_123 = arith.constant 0 : index
    %c0_124 = arith.constant 0 : index
    %198 = vector.load %arg7[%c2_122, %c0_123, %c0_124] : memref<4x8x8xbf16, #tpu.memory_space<vmem>>, vector<1x8x8xbf16>
    %199 = vector.shape_cast %198 : vector<1x8x8xbf16> to vector<8x8xbf16>
    %cst_125 = arith.constant dense<0.000000e+00> : vector<16x8xf32>
    %200 = tpu.matmul %190, %199, %cst_125 {dimension_numbers = #tpu.dot_dimension_numbers<[1], [0], [0], [1], [0, 0, 1, 1], [], []>} : vector<16x8xbf16>, vector<8x8xbf16>, vector<16x8xf32> -> vector<16x8xf32>
    %c2_126 = arith.constant 2 : index
    %c0_127 = arith.constant 0 : index
    %c0_128 = arith.constant 0 : index
    %201 = vector.load %arg8[%c2_126, %c0_127, %c0_128] : memref<4x1x8xf32, #tpu.memory_space<vmem>>, vector<1x1x8xf32>
    %202 = vector.shape_cast %201 : vector<1x1x8xf32> to vector<1x8xf32>
    %203 = vector.broadcast %202 : vector<1x8xf32> to vector<16x8xf32>
    %204 = arith.addf %200, %203 : vector<16x8xf32>
    %c2_129 = arith.constant 2 : index
    %c0_130 = arith.constant 0 : index
    %c0_131 = arith.constant 0 : index
    %205 = vector.load %arg9[%c2_129, %c0_130, %c0_131] : memref<4x8x8xbf16, #tpu.memory_space<vmem>>, vector<1x8x8xbf16>
    %206 = vector.shape_cast %205 : vector<1x8x8xbf16> to vector<8x8xbf16>
    %cst_132 = arith.constant dense<0.000000e+00> : vector<16x8xf32>
    %207 = tpu.matmul %190, %206, %cst_132 {dimension_numbers = #tpu.dot_dimension_numbers<[1], [0], [0], [1], [0, 0, 1, 1], [], []>} : vector<16x8xbf16>, vector<8x8xbf16>, vector<16x8xf32> -> vector<16x8xf32>
    %c2_133 = arith.constant 2 : index
    %c0_134 = arith.constant 0 : index
    %c0_135 = arith.constant 0 : index
    %208 = vector.load %arg10[%c2_133, %c0_134, %c0_135] : memref<4x1x8xf32, #tpu.memory_space<vmem>>, vector<1x1x8xf32>
    %209 = vector.shape_cast %208 : vector<1x1x8xf32> to vector<1x8xf32>
    %210 = vector.broadcast %209 : vector<1x8xf32> to vector<16x8xf32>
    %211 = arith.addf %207, %210 : vector<16x8xf32>
    %cst_136 = arith.constant 0.353553385 : f32
    %212 = vector.broadcast %cst_136 : f32 to vector<16x8xf32>
    %213 = arith.mulf %197, %212 : vector<16x8xf32>
    %214 = arith.truncf %213 : vector<16x8xf32> to vector<16x8xbf16>
    %215 = arith.truncf %204 : vector<16x8xf32> to vector<16x8xbf16>
    %216 = arith.truncf %211 : vector<16x8xf32> to vector<16x8xbf16>
    %c2_137 = arith.constant 2 : index
    %c0_138 = arith.constant 0 : index
    %c0_139 = arith.constant 0 : index
    %217 = vector.load %arg11[%c2_137, %c0_138, %c0_139] : memref<4x8x8xbf16, #tpu.memory_space<vmem>>, vector<1x8x8xbf16>
    %218 = vector.shape_cast %217 : vector<1x8x8xbf16> to vector<8x8xbf16>
    %cst_140 = arith.constant 0.000000e+00 : f32
    %219 = vector.broadcast %cst_140 : f32 to vector<16x8xf32>
    %220 = vector.extract_strided_slice %214 {offsets = [0, 0], sizes = [16, 4], strides = [1, 1]} : vector<16x8xbf16> to vector<16x4xbf16>
    %221 = vector.extract_strided_slice %215 {offsets = [0, 0], sizes = [16, 4], strides = [1, 1]} : vector<16x8xbf16> to vector<16x4xbf16>
    %cst_141 = arith.constant dense<0.000000e+00> : vector<16x16xf32>
    %222 = tpu.matmul %220, %221, %cst_141 {dimension_numbers = #tpu.dot_dimension_numbers<[1], [1], [0], [0], [0, 0, 1, 0], [], []>} : vector<16x4xbf16>, vector<16x4xbf16>, vector<16x16xf32> -> vector<16x16xf32>
    %cst_142 = arith.constant dense<0xFF800000> : vector<16xf32>
    %223 = vector.multi_reduction <maximumf>, %222, %cst_142 [1] : vector<16x16xf32> to vector<16xf32>
    %224 = vector.shape_cast %223 : vector<16xf32> to vector<16x1xf32>
    %225 = vector.broadcast %224 : vector<16x1xf32> to vector<16x16xf32>
    %226 = arith.subf %222, %225 : vector<16x16xf32>
    %227 = math.exp %226 : vector<16x16xf32>
    %cst_143 = arith.constant dense<0.000000e+00> : vector<16xf32>
    %228 = vector.multi_reduction <add>, %227, %cst_143 [1] : vector<16x16xf32> to vector<16xf32>
    %229 = vector.shape_cast %228 : vector<16xf32> to vector<16x1xf32>
    %230 = tpu.reciprocal %229 {approx = true} : vector<16x1xf32> -> vector<16x1xf32>
    %231 = vector.broadcast %230 : vector<16x1xf32> to vector<16x16xf32>
    %232 = arith.mulf %227, %231 : vector<16x16xf32>
    %233 = arith.truncf %232 : vector<16x16xf32> to vector<16x16xbf16>
    %234 = vector.extract_strided_slice %216 {offsets = [0, 0], sizes = [16, 4], strides = [1, 1]} : vector<16x8xbf16> to vector<16x4xbf16>
    %cst_144 = arith.constant dense<0.000000e+00> : vector<16x4xf32>
    %235 = tpu.matmul %233, %234, %cst_144 {dimension_numbers = #tpu.dot_dimension_numbers<[1], [0], [0], [1], [0, 0, 1, 1], [], []>} : vector<16x16xbf16>, vector<16x4xbf16>, vector<16x4xf32> -> vector<16x4xf32>
    %236 = arith.truncf %235 : vector<16x4xf32> to vector<16x4xbf16>
    %237 = vector.extract_strided_slice %218 {offsets = [0, 0], sizes = [4, 8], strides = [1, 1]} : vector<8x8xbf16> to vector<4x8xbf16>
    %cst_145 = arith.constant dense<0.000000e+00> : vector<16x8xf32>
    %238 = tpu.matmul %236, %237, %cst_145 {dimension_numbers = #tpu.dot_dimension_numbers<[1], [0], [0], [1], [0, 0, 1, 1], [], []>} : vector<16x4xbf16>, vector<4x8xbf16>, vector<16x8xf32> -> vector<16x8xf32>
    %239 = arith.addf %219, %238 : vector<16x8xf32>
    %240 = vector.extract_strided_slice %214 {offsets = [0, 4], sizes = [16, 4], strides = [1, 1]} : vector<16x8xbf16> to vector<16x4xbf16>
    %241 = vector.extract_strided_slice %215 {offsets = [0, 4], sizes = [16, 4], strides = [1, 1]} : vector<16x8xbf16> to vector<16x4xbf16>
    %cst_146 = arith.constant dense<0.000000e+00> : vector<16x16xf32>
    %242 = tpu.matmul %240, %241, %cst_146 {dimension_numbers = #tpu.dot_dimension_numbers<[1], [1], [0], [0], [0, 0, 1, 0], [], []>} : vector<16x4xbf16>, vector<16x4xbf16>, vector<16x16xf32> -> vector<16x16xf32>
    %cst_147 = arith.constant dense<0xFF800000> : vector<16xf32>
    %243 = vector.multi_reduction <maximumf>, %242, %cst_147 [1] : vector<16x16xf32> to vector<16xf32>
    %244 = vector.shape_cast %243 : vector<16xf32> to vector<16x1xf32>
    %245 = vector.broadcast %244 : vector<16x1xf32> to vector<16x16xf32>
    %246 = arith.subf %242, %245 : vector<16x16xf32>
    %247 = math.exp %246 : vector<16x16xf32>
    %cst_148 = arith.constant dense<0.000000e+00> : vector<16xf32>
    %248 = vector.multi_reduction <add>, %247, %cst_148 [1] : vector<16x16xf32> to vector<16xf32>
    %249 = vector.shape_cast %248 : vector<16xf32> to vector<16x1xf32>
    %250 = tpu.reciprocal %249 {approx = true} : vector<16x1xf32> -> vector<16x1xf32>
    %251 = vector.broadcast %250 : vector<16x1xf32> to vector<16x16xf32>
    %252 = arith.mulf %247, %251 : vector<16x16xf32>
    %253 = arith.truncf %252 : vector<16x16xf32> to vector<16x16xbf16>
    %254 = vector.extract_strided_slice %216 {offsets = [0, 4], sizes = [16, 4], strides = [1, 1]} : vector<16x8xbf16> to vector<16x4xbf16>
    %cst_149 = arith.constant dense<0.000000e+00> : vector<16x4xf32>
    %255 = tpu.matmul %253, %254, %cst_149 {dimension_numbers = #tpu.dot_dimension_numbers<[1], [0], [0], [1], [0, 0, 1, 1], [], []>} : vector<16x16xbf16>, vector<16x4xbf16>, vector<16x4xf32> -> vector<16x4xf32>
    %256 = arith.truncf %255 : vector<16x4xf32> to vector<16x4xbf16>
    %257 = vector.extract_strided_slice %218 {offsets = [4, 0], sizes = [4, 8], strides = [1, 1]} : vector<8x8xbf16> to vector<4x8xbf16>
    %cst_150 = arith.constant dense<0.000000e+00> : vector<16x8xf32>
    %258 = tpu.matmul %256, %257, %cst_150 {dimension_numbers = #tpu.dot_dimension_numbers<[1], [0], [0], [1], [0, 0, 1, 1], [], []>} : vector<16x4xbf16>, vector<4x8xbf16>, vector<16x8xf32> -> vector<16x8xf32>
    %259 = arith.addf %239, %258 : vector<16x8xf32>
    %c2_151 = arith.constant 2 : index
    %c0_152 = arith.constant 0 : index
    %c0_153 = arith.constant 0 : index
    %260 = vector.load %arg12[%c2_151, %c0_152, %c0_153] : memref<4x1x8xf32, #tpu.memory_space<vmem>>, vector<1x1x8xf32>
    %261 = vector.shape_cast %260 : vector<1x1x8xf32> to vector<1x8xf32>
    %262 = vector.broadcast %261 : vector<1x8xf32> to vector<16x8xf32>
    %263 = arith.addf %259, %262 : vector<16x8xf32>
    %264 = arith.truncf %263 : vector<16x8xf32> to vector<16x8xbf16>
    %c2_154 = arith.constant 2 : index
    %c0_155 = arith.constant 0 : index
    %c0_156 = arith.constant 0 : index
    %265 = vector.load %arg13[%c2_154, %c0_155, %c0_156] : memref<4x8x32xbf16, #tpu.memory_space<vmem>>, vector<1x8x32xbf16>
    %266 = vector.shape_cast %265 : vector<1x8x32xbf16> to vector<8x32xbf16>
    %cst_157 = arith.constant dense<0.000000e+00> : vector<16x32xf32>
    %267 = tpu.matmul %264, %266, %cst_157 {dimension_numbers = #tpu.dot_dimension_numbers<[1], [0], [0], [1], [0, 0, 1, 1], [], []>} : vector<16x8xbf16>, vector<8x32xbf16>, vector<16x32xf32> -> vector<16x32xf32>
    %268 = arith.addf %178, %267 : vector<16x32xf32>
    %c3 = arith.constant 3 : index
    %c0_158 = arith.constant 0 : index
    %c0_159 = arith.constant 0 : index
    %269 = vector.load %arg3[%c3, %c0_158, %c0_159] : memref<4x32x8xbf16, #tpu.memory_space<vmem>>, vector<1x32x8xbf16>
    %270 = vector.shape_cast %269 : vector<1x32x8xbf16> to vector<32x8xbf16>
    %cst_160 = arith.constant dense<0.000000e+00> : vector<16x8xf32>
    %271 = tpu.matmul %1, %270, %cst_160 {dimension_numbers = #tpu.dot_dimension_numbers<[1], [0], [0], [1], [0, 0, 1, 1], [], []>} : vector<16x32xbf16>, vector<32x8xbf16>, vector<16x8xf32> -> vector<16x8xf32>
    %c3_161 = arith.constant 3 : index
    %c0_162 = arith.constant 0 : index
    %c0_163 = arith.constant 0 : index
    %272 = vector.load %arg2[%c3_161, %c0_162, %c0_163] : memref<4x16x16xbf16, #tpu.memory_space<vmem>>, vector<1x16x16xbf16>
    %273 = vector.shape_cast %272 : vector<1x16x16xbf16> to vector<16x16xbf16>
    %274 = arith.truncf %271 : vector<16x8xf32> to vector<16x8xbf16>
    %cst_164 = arith.constant dense<0.000000e+00> : vector<16x8xf32>
    %275 = tpu.matmul %273, %274, %cst_164 {dimension_numbers = #tpu.dot_dimension_numbers<[1], [0], [0], [1], [0, 0, 1, 1], [], []>} : vector<16x16xbf16>, vector<16x8xbf16>, vector<16x8xf32> -> vector<16x8xf32>
    %c3_165 = arith.constant 3 : index
    %c0_166 = arith.constant 0 : index
    %c0_167 = arith.constant 0 : index
    %276 = vector.load %arg4[%c3_165, %c0_166, %c0_167] : memref<4x1x8xf32, #tpu.memory_space<vmem>>, vector<1x1x8xf32>
    %277 = vector.shape_cast %276 : vector<1x1x8xf32> to vector<1x8xf32>
    %278 = vector.broadcast %277 : vector<1x8xf32> to vector<16x8xf32>
    %279 = arith.addf %275, %278 : vector<16x8xf32>
    %280 = arith.truncf %279 : vector<16x8xf32> to vector<16x8xbf16>
    %c3_168 = arith.constant 3 : index
    %c0_169 = arith.constant 0 : index
    %c0_170 = arith.constant 0 : index
    %281 = vector.load %arg5[%c3_168, %c0_169, %c0_170] : memref<4x8x8xbf16, #tpu.memory_space<vmem>>, vector<1x8x8xbf16>
    %282 = vector.shape_cast %281 : vector<1x8x8xbf16> to vector<8x8xbf16>
    %cst_171 = arith.constant dense<0.000000e+00> : vector<16x8xf32>
    %283 = tpu.matmul %280, %282, %cst_171 {dimension_numbers = #tpu.dot_dimension_numbers<[1], [0], [0], [1], [0, 0, 1, 1], [], []>} : vector<16x8xbf16>, vector<8x8xbf16>, vector<16x8xf32> -> vector<16x8xf32>
    %c3_172 = arith.constant 3 : index
    %c0_173 = arith.constant 0 : index
    %c0_174 = arith.constant 0 : index
    %284 = vector.load %arg6[%c3_172, %c0_173, %c0_174] : memref<4x1x8xf32, #tpu.memory_space<vmem>>, vector<1x1x8xf32>
    %285 = vector.shape_cast %284 : vector<1x1x8xf32> to vector<1x8xf32>
    %286 = vector.broadcast %285 : vector<1x8xf32> to vector<16x8xf32>
    %287 = arith.addf %283, %286 : vector<16x8xf32>
    %c3_175 = arith.constant 3 : index
    %c0_176 = arith.constant 0 : index
    %c0_177 = arith.constant 0 : index
    %288 = vector.load %arg7[%c3_175, %c0_176, %c0_177] : memref<4x8x8xbf16, #tpu.memory_space<vmem>>, vector<1x8x8xbf16>
    %289 = vector.shape_cast %288 : vector<1x8x8xbf16> to vector<8x8xbf16>
    %cst_178 = arith.constant dense<0.000000e+00> : vector<16x8xf32>
    %290 = tpu.matmul %280, %289, %cst_178 {dimension_numbers = #tpu.dot_dimension_numbers<[1], [0], [0], [1], [0, 0, 1, 1], [], []>} : vector<16x8xbf16>, vector<8x8xbf16>, vector<16x8xf32> -> vector<16x8xf32>
    %c3_179 = arith.constant 3 : index
    %c0_180 = arith.constant 0 : index
    %c0_181 = arith.constant 0 : index
    %291 = vector.load %arg8[%c3_179, %c0_180, %c0_181] : memref<4x1x8xf32, #tpu.memory_space<vmem>>, vector<1x1x8xf32>
    %292 = vector.shape_cast %291 : vector<1x1x8xf32> to vector<1x8xf32>
    %293 = vector.broadcast %292 : vector<1x8xf32> to vector<16x8xf32>
    %294 = arith.addf %290, %293 : vector<16x8xf32>
    %c3_182 = arith.constant 3 : index
    %c0_183 = arith.constant 0 : index
    %c0_184 = arith.constant 0 : index
    %295 = vector.load %arg9[%c3_182, %c0_183, %c0_184] : memref<4x8x8xbf16, #tpu.memory_space<vmem>>, vector<1x8x8xbf16>
    %296 = vector.shape_cast %295 : vector<1x8x8xbf16> to vector<8x8xbf16>
    %cst_185 = arith.constant dense<0.000000e+00> : vector<16x8xf32>
    %297 = tpu.matmul %280, %296, %cst_185 {dimension_numbers = #tpu.dot_dimension_numbers<[1], [0], [0], [1], [0, 0, 1, 1], [], []>} : vector<16x8xbf16>, vector<8x8xbf16>, vector<16x8xf32> -> vector<16x8xf32>
    %c3_186 = arith.constant 3 : index
    %c0_187 = arith.constant 0 : index
    %c0_188 = arith.constant 0 : index
    %298 = vector.load %arg10[%c3_186, %c0_187, %c0_188] : memref<4x1x8xf32, #tpu.memory_space<vmem>>, vector<1x1x8xf32>
    %299 = vector.shape_cast %298 : vector<1x1x8xf32> to vector<1x8xf32>
    %300 = vector.broadcast %299 : vector<1x8xf32> to vector<16x8xf32>
    %301 = arith.addf %297, %300 : vector<16x8xf32>
    %cst_189 = arith.constant 0.353553385 : f32
    %302 = vector.broadcast %cst_189 : f32 to vector<16x8xf32>
    %303 = arith.mulf %287, %302 : vector<16x8xf32>
    %304 = arith.truncf %303 : vector<16x8xf32> to vector<16x8xbf16>
    %305 = arith.truncf %294 : vector<16x8xf32> to vector<16x8xbf16>
    %306 = arith.truncf %301 : vector<16x8xf32> to vector<16x8xbf16>
    %c3_190 = arith.constant 3 : index
    %c0_191 = arith.constant 0 : index
    %c0_192 = arith.constant 0 : index
    %307 = vector.load %arg11[%c3_190, %c0_191, %c0_192] : memref<4x8x8xbf16, #tpu.memory_space<vmem>>, vector<1x8x8xbf16>
    %308 = vector.shape_cast %307 : vector<1x8x8xbf16> to vector<8x8xbf16>
    %cst_193 = arith.constant 0.000000e+00 : f32
    %309 = vector.broadcast %cst_193 : f32 to vector<16x8xf32>
    %310 = vector.extract_strided_slice %304 {offsets = [0, 0], sizes = [16, 4], strides = [1, 1]} : vector<16x8xbf16> to vector<16x4xbf16>
    %311 = vector.extract_strided_slice %305 {offsets = [0, 0], sizes = [16, 4], strides = [1, 1]} : vector<16x8xbf16> to vector<16x4xbf16>
    %cst_194 = arith.constant dense<0.000000e+00> : vector<16x16xf32>
    %312 = tpu.matmul %310, %311, %cst_194 {dimension_numbers = #tpu.dot_dimension_numbers<[1], [1], [0], [0], [0, 0, 1, 0], [], []>} : vector<16x4xbf16>, vector<16x4xbf16>, vector<16x16xf32> -> vector<16x16xf32>
    %cst_195 = arith.constant dense<0xFF800000> : vector<16xf32>
    %313 = vector.multi_reduction <maximumf>, %312, %cst_195 [1] : vector<16x16xf32> to vector<16xf32>
    %314 = vector.shape_cast %313 : vector<16xf32> to vector<16x1xf32>
    %315 = vector.broadcast %314 : vector<16x1xf32> to vector<16x16xf32>
    %316 = arith.subf %312, %315 : vector<16x16xf32>
    %317 = math.exp %316 : vector<16x16xf32>
    %cst_196 = arith.constant dense<0.000000e+00> : vector<16xf32>
    %318 = vector.multi_reduction <add>, %317, %cst_196 [1] : vector<16x16xf32> to vector<16xf32>
    %319 = vector.shape_cast %318 : vector<16xf32> to vector<16x1xf32>
    %320 = tpu.reciprocal %319 {approx = true} : vector<16x1xf32> -> vector<16x1xf32>
    %321 = vector.broadcast %320 : vector<16x1xf32> to vector<16x16xf32>
    %322 = arith.mulf %317, %321 : vector<16x16xf32>
    %323 = arith.truncf %322 : vector<16x16xf32> to vector<16x16xbf16>
    %324 = vector.extract_strided_slice %306 {offsets = [0, 0], sizes = [16, 4], strides = [1, 1]} : vector<16x8xbf16> to vector<16x4xbf16>
    %cst_197 = arith.constant dense<0.000000e+00> : vector<16x4xf32>
    %325 = tpu.matmul %323, %324, %cst_197 {dimension_numbers = #tpu.dot_dimension_numbers<[1], [0], [0], [1], [0, 0, 1, 1], [], []>} : vector<16x16xbf16>, vector<16x4xbf16>, vector<16x4xf32> -> vector<16x4xf32>
    %326 = arith.truncf %325 : vector<16x4xf32> to vector<16x4xbf16>
    %327 = vector.extract_strided_slice %308 {offsets = [0, 0], sizes = [4, 8], strides = [1, 1]} : vector<8x8xbf16> to vector<4x8xbf16>
    %cst_198 = arith.constant dense<0.000000e+00> : vector<16x8xf32>
    %328 = tpu.matmul %326, %327, %cst_198 {dimension_numbers = #tpu.dot_dimension_numbers<[1], [0], [0], [1], [0, 0, 1, 1], [], []>} : vector<16x4xbf16>, vector<4x8xbf16>, vector<16x8xf32> -> vector<16x8xf32>
    %329 = arith.addf %309, %328 : vector<16x8xf32>
    %330 = vector.extract_strided_slice %304 {offsets = [0, 4], sizes = [16, 4], strides = [1, 1]} : vector<16x8xbf16> to vector<16x4xbf16>
    %331 = vector.extract_strided_slice %305 {offsets = [0, 4], sizes = [16, 4], strides = [1, 1]} : vector<16x8xbf16> to vector<16x4xbf16>
    %cst_199 = arith.constant dense<0.000000e+00> : vector<16x16xf32>
    %332 = tpu.matmul %330, %331, %cst_199 {dimension_numbers = #tpu.dot_dimension_numbers<[1], [1], [0], [0], [0, 0, 1, 0], [], []>} : vector<16x4xbf16>, vector<16x4xbf16>, vector<16x16xf32> -> vector<16x16xf32>
    %cst_200 = arith.constant dense<0xFF800000> : vector<16xf32>
    %333 = vector.multi_reduction <maximumf>, %332, %cst_200 [1] : vector<16x16xf32> to vector<16xf32>
    %334 = vector.shape_cast %333 : vector<16xf32> to vector<16x1xf32>
    %335 = vector.broadcast %334 : vector<16x1xf32> to vector<16x16xf32>
    %336 = arith.subf %332, %335 : vector<16x16xf32>
    %337 = math.exp %336 : vector<16x16xf32>
    %cst_201 = arith.constant dense<0.000000e+00> : vector<16xf32>
    %338 = vector.multi_reduction <add>, %337, %cst_201 [1] : vector<16x16xf32> to vector<16xf32>
    %339 = vector.shape_cast %338 : vector<16xf32> to vector<16x1xf32>
    %340 = tpu.reciprocal %339 {approx = true} : vector<16x1xf32> -> vector<16x1xf32>
    %341 = vector.broadcast %340 : vector<16x1xf32> to vector<16x16xf32>
    %342 = arith.mulf %337, %341 : vector<16x16xf32>
    %343 = arith.truncf %342 : vector<16x16xf32> to vector<16x16xbf16>
    %344 = vector.extract_strided_slice %306 {offsets = [0, 4], sizes = [16, 4], strides = [1, 1]} : vector<16x8xbf16> to vector<16x4xbf16>
    %cst_202 = arith.constant dense<0.000000e+00> : vector<16x4xf32>
    %345 = tpu.matmul %343, %344, %cst_202 {dimension_numbers = #tpu.dot_dimension_numbers<[1], [0], [0], [1], [0, 0, 1, 1], [], []>} : vector<16x16xbf16>, vector<16x4xbf16>, vector<16x4xf32> -> vector<16x4xf32>
    %346 = arith.truncf %345 : vector<16x4xf32> to vector<16x4xbf16>
    %347 = vector.extract_strided_slice %308 {offsets = [4, 0], sizes = [4, 8], strides = [1, 1]} : vector<8x8xbf16> to vector<4x8xbf16>
    %cst_203 = arith.constant dense<0.000000e+00> : vector<16x8xf32>
    %348 = tpu.matmul %346, %347, %cst_203 {dimension_numbers = #tpu.dot_dimension_numbers<[1], [0], [0], [1], [0, 0, 1, 1], [], []>} : vector<16x4xbf16>, vector<4x8xbf16>, vector<16x8xf32> -> vector<16x8xf32>
    %349 = arith.addf %329, %348 : vector<16x8xf32>
    %c3_204 = arith.constant 3 : index
    %c0_205 = arith.constant 0 : index
    %c0_206 = arith.constant 0 : index
    %350 = vector.load %arg12[%c3_204, %c0_205, %c0_206] : memref<4x1x8xf32, #tpu.memory_space<vmem>>, vector<1x1x8xf32>
    %351 = vector.shape_cast %350 : vector<1x1x8xf32> to vector<1x8xf32>
    %352 = vector.broadcast %351 : vector<1x8xf32> to vector<16x8xf32>
    %353 = arith.addf %349, %352 : vector<16x8xf32>
    %354 = arith.truncf %353 : vector<16x8xf32> to vector<16x8xbf16>
    %c3_207 = arith.constant 3 : index
    %c0_208 = arith.constant 0 : index
    %c0_209 = arith.constant 0 : index
    %355 = vector.load %arg13[%c3_207, %c0_208, %c0_209] : memref<4x8x32xbf16, #tpu.memory_space<vmem>>, vector<1x8x32xbf16>
    %356 = vector.shape_cast %355 : vector<1x8x32xbf16> to vector<8x32xbf16>
    %cst_210 = arith.constant dense<0.000000e+00> : vector<16x32xf32>
    %357 = tpu.matmul %354, %356, %cst_210 {dimension_numbers = #tpu.dot_dimension_numbers<[1], [0], [0], [1], [0, 0, 1, 1], [], []>} : vector<16x8xbf16>, vector<8x32xbf16>, vector<16x32xf32> -> vector<16x32xf32>
    %358 = arith.addf %268, %357 : vector<16x32xf32>
    %c0_211 = arith.constant 0 : index
    %c0_212 = arith.constant 0 : index
    %359 = vector.load %arg14[%c0_211, %c0_212] : memref<1x32xf32, #tpu.memory_space<vmem>>, vector<1x32xf32>
    %360 = vector.broadcast %359 : vector<1x32xf32> to vector<16x32xf32>
    %361 = arith.addf %358, %360 : vector<16x32xf32>
    %c0_213 = arith.constant 0 : index
    %c0_214 = arith.constant 0 : index
    %c0_215 = arith.constant 0 : index
    %362 = vector.load %arg15[%c0_213, %c0_214, %c0_215] : memref<1x16x32xf32, #tpu.memory_space<vmem>>, vector<1x16x32xf32>
    %363 = vector.shape_cast %362 : vector<1x16x32xf32> to vector<16x32xf32>
    %364 = vector.shape_cast %361 : vector<16x32xf32> to vector<1x16x32xf32>
    tpu.vector_store %arg15[%c0_213, %c0_214, %c0_215], %364 {strides = array<i32>} : memref<1x16x32xf32, #tpu.memory_space<vmem>>, vector<1x16x32xf32>,
    return
  }
  func.func @transform_0(%arg0: i32) -> (i32, i32, i32) {
    %c0_i32 = arith.constant 0 : i32
    %c0_i32_0 = arith.constant 0 : i32
    %c0_i32_1 = arith.constant 0 : i32
    return %arg0, %c0_i32, %c0_i32_0 : i32, i32, i32
  }
  func.func @transform_1(%arg0: i32) -> (i32, i32, i32) {
    %c0_i32 = arith.constant 0 : i32
    %c0_i32_0 = arith.constant 0 : i32
    %c0_i32_1 = arith.constant 0 : i32
    %c0_i32_2 = arith.constant 0 : i32
    return %c0_i32, %c0_i32_0, %c0_i32_1 : i32, i32, i32
  }
  func.func @transform_2(%arg0: i32) -> (i32, i32, i32) {
    %c0_i32 = arith.constant 0 : i32
    %c0_i32_0 = arith.constant 0 : i32
    %c0_i32_1 = arith.constant 0 : i32
    %c0_i32_2 = arith.constant 0 : i32
    return %c0_i32, %c0_i32_0, %c0_i32_1 : i32, i32, i32
  }
  func.func @transform_3(%arg0: i32) -> (i32, i32, i32) {
    %c0_i32 = arith.constant 0 : i32
    %c0_i32_0 = arith.constant 0 : i32
    %c0_i32_1 = arith.constant 0 : i32
    %c0_i32_2 = arith.constant 0 : i32
    return %c0_i32, %c0_i32_0, %c0_i32_1 : i32, i32, i32
  }
  func.func @transform_4(%arg0: i32) -> (i32, i32, i32) {
    %c0_i32 = arith.constant 0 : i32
    %c0_i32_0 = arith.constant 0 : i32
    %c0_i32_1 = arith.constant 0 : i32
    %c0_i32_2 = arith.constant 0 : i32
    return %c0_i32, %c0_i32_0, %c0_i32_1 : i32, i32, i32
  }
  func.func @transform_5(%arg0: i32) -> (i32, i32, i32) {
    %c0_i32 = arith.constant 0 : i32
    %c0_i32_0 = arith.constant 0 : i32
    %c0_i32_1 = arith.constant 0 : i32
    %c0_i32_2 = arith.constant 0 : i32
    return %c0_i32, %c0_i32_0, %c0_i32_1 : i32, i32, i32
  }
  func.func @transform_6(%arg0: i32) -> (i32, i32, i32) {
    %c0_i32 = arith.constant 0 : i32
    %c0_i32_0 = arith.constant 0 : i32
    %c0_i32_1 = arith.constant 0 : i32
    %c0_i32_2 = arith.constant 0 : i32
    return %c0_i32, %c0_i32_0, %c0_i32_1 : i32, i32, i32
  }
  func.func @transform_7(%arg0: i32) -> (i32, i32, i32) {
    %c0_i32 = arith.constant 0 : i32
    %c0_i32_0 = arith.constant 0 : i32
    %c0_i32_1 = arith.constant 0 : i32
    %c0_i32_2 = arith.constant 0 : i32
    return %c0_i32, %c0_i32_0, %c0_i32_1 : i32, i32, i32
  }
  func.func @transform_8(%arg0: i32) -> (i32, i32, i32) {
    %c0_i32 = arith.constant 0 : i32
    %c0_i32_0 = arith.constant 0 : i32
    %c0_i32_1 = arith.constant 0 : i32
    %c0_i32_2 = arith.constant 0 : i32
    return %c0_i32, %c0_i32_0, %c0_i32_1 : i32, i32, i32
  }
  func.func @transform_9(%arg0: i32) -> (i32, i32, i32) {
    %c0_i32 = arith.constant 0 : i32
    %c0_i32_0 = arith.constant 0 : i32
    %c0_i32_1 = arith.constant 0 : i32
    %c0_i32_2 = arith.constant 0 : i32
    return %c0_i32, %c0_i32_0, %c0_i32_1 : i32, i32, i32
  }
  func.func @transform_10(%arg0: i32) -> (i32, i32, i32) {
    %c0_i32 = arith.constant 0 : i32
    %c0_i32_0 = arith.constant 0 : i32
    %c0_i32_1 = arith.constant 0 : i32
    %c0_i32_2 = arith.constant 0 : i32
    return %c0_i32, %c0_i32_0, %c0_i32_1 : i32, i32, i32
  }
  func.func @transform_11(%arg0: i32) -> (i32, i32, i32) {
    %c0_i32 = arith.constant 0 : i32
    %c0_i32_0 = arith.constant 0 : i32
    %c0_i32_1 = arith.constant 0 : i32
    %c0_i32_2 = arith.constant 0 : i32
    return %c0_i32, %c0_i32_0, %c0_i32_1 : i32, i32, i32
  }
  func.func @transform_12(%arg0: i32) -> (i32, i32, i32) {
    %c0_i32 = arith.constant 0 : i32
    %c0_i32_0 = arith.constant 0 : i32
    %c0_i32_1 = arith.constant 0 : i32
    %c0_i32_2 = arith.constant 0 : i32
    return %c0_i32, %c0_i32_0, %c0_i32_1 : i32, i32, i32
  }
  func.func @transform_13(%arg0: i32) -> (i32, i32) {
    %c0_i32 = arith.constant 0 : i32
    %c0_i32_0 = arith.constant 0 : i32
    %c0_i32_1 = arith.constant 0 : i32
    return %c0_i32, %c0_i32_0 : i32, i32
  }
  func.func @transform_14(%arg0: i32) -> (i32, i32, i32) {
    %c0_i32 = arith.constant 0 : i32
    %c0_i32_0 = arith.constant 0 : i32
    %c0_i32_1 = arith.constant 0 : i32
    return %arg0, %c0_i32, %c0_i32_0 : i32, i32, i32
  }
}

</mosaic_0001>

<bundles_post_ra>
// kernel: tpu_custom_call.1
= control target key start
LH: loop header
LB: loop body
LE: loop exit
PB: predicated region body
PF: predicated region fallthrough
CT: control target
= control target key end

     0   :  { %s5063_s0 = inlined_call_operand.vmem [shape: bf16[2,16,32], index: 0, kind: input, shape index: {}]   ;;  %s5064_s1 = inlined_call_operand.vmem [shape: bf16[4,16,16], index: 1, kind: input, shape index: {}]   ;;  %s5065_s2 = inlined_call_operand.vmem [shape: bf16[4,32,8], index: 2, kind: input, shape index: {}]   ;;  %s5066_s3 = inlined_call_operand.hbm [shape: f32[4,1,8], index: 3, kind: input, shape index: {}]   ;;  %s5067_s4 = inlined_call_operand.vmem [shape: bf16[4,8,8], index: 4, kind: input, shape index: {}]   ;;  %s5068_s5 = inlined_call_operand.hbm [shape: f32[4,1,8], index: 5, kind: input, shape index: {}]   ;;  %s5069_s6 = inlined_call_operand.vmem [shape: bf16[4,8,8], index: 6, kind: input, shape index: {}]   ;;  %s5070_s7 = inlined_call_operand.hbm [shape: f32[4,1,8], index: 7, kind: input, shape index: {}]   ;;  %s5071_s8 = inlined_call_operand.vmem [shape: bf16[4,8,8], index: 8, kind: input, shape index: {}]   ;;  %s5072_s9 = inlined_call_operand.hbm [shape: f32[4,1,8], index: 9, kind: input, shape index: {}]   ;;  %s5073_s10 = inlined_call_operand.vmem [shape: bf16[4,8,8], index: 10, kind: input, shape index: {}]   ;;  %s5074_s11 = inlined_call_operand.vmem [shape: f32[4,1,8], index: 11, kind: input, shape index: {}]   ;;  %s5075_s12 = inlined_call_operand.hbm [shape: bf16[4,8,32], index: 12, kind: input, shape index: {}]   ;;  %s5076_s13 = inlined_call_operand.vmem [shape: f32[1,32], index: 13, kind: input, shape index: {}]   ;;  %s5077_s14 = inlined_call_operand.hbm [shape: f32[2,16,32], index: 14, kind: output, shape index: {}]  }
   0x1   :  { %5091 = sst [smem:[#allocation24_spill]] %s5068_s5 }
   0x2   :  { %5092 = sst [smem:[#allocation25_spill]] %s5076_s13 }
   0x3   :  { %5093 = sst [smem:[#allocation26_spill]] %s5077_s14 }
   0x4   :  { %19 = vsyncpa [#allocation3], 0 }
   0x5   :  { %20 = vsyncpa [#allocation6], 0 }
   0x6   :  { %21 = vsyncpa [#allocation9], 0 }
   0x7   :  { %22 = vsyncpa [#allocation4], 0 }
   0x8   :  { %24 = vsyncpa [#allocation4 + $0x1], 0  ;;  %s4408_s29 = smov 0   ;;  %s4410_s30 = smov 0  }
   0x9   :  { %s4412_s15 = smov 0   ;;  %s4414_s16 = smov 0  }
   0xa LB: > { %5094 = sst [smem:[#allocation16_spill]] %s4304_s29  ;;  %s4429_s17 = sadd.s32 4294967295, %s4316_s16   ;;  %s4316_s16 = sphi %s4414_s16, %s5124_s16   ;;  %s4312_s15 = sphi %s4412_s15, %s5127_s15   ;;  %s4308_s30 = sphi %s4410_s30, %s5126_s30   ;;  %s4304_s29 = sphi %s4408_s29, %s5125_s29  }
   0xb   : > { %5095 = sst [smem:[#allocation17_spill]] %s4308_s30  ;;  %s3393_s18 = sadd.s32 4294967294, %s4316_s16  }
   0xc   : > { %5096 = sst [smem:[#allocation18_spill]] %s4312_s15  ;;  %s4433_s19 = sadd.s32 1, %s4316_s16  }
   0xd   : > { %5097 = sst [smem:[#allocation19_spill]] %s4316_s16  ;;  %s336_s20 = sadd.s32 1, %s4312_s15 }
   0xe   : > { %5098 = sst [smem:[#allocation20_spill]] %s4433_s19  ;;  %s333_s21 = ssub.s32 %s4316_s16, %s4433_s19 }
   0xf   : > { %p346_p0 = scmp.ne.s32.totalorder %s4312_s15, %s4308_s30  ;;  %p334_p1 = scmp.eq.s32.totalorder %s333_s21, 0 }
  0x10   : > { %p347_p2 = scmp.eq.s32.totalorder %s4429_s17, 1  ;;  %p352_p3 = scmp.ne.s32.totalorder %s4308_s30, %s4304_s29 }
  0x11   : > { %p353_p4 = scmp.eq.s32.totalorder %s3393_s18, 1  ;;  %p3394_p7 = scmp.ge.s32.totalorder %s4316_s16, 1 }
  0x12   : > { %s4444_s22 = scalar_select %p334_p1, %s4312_s15, %s336_s20  }
  0x13   : > { %p4446_p5 = por %p347_p2, %p346_p0  ;;  %p4450_p6 = por %p353_p4, %p352_p3 }
  0x14   : > { %5099 = sst [smem:[#allocation21_spill]] %s4444_s22  ;;  %p360_p8 = scmp.lt.s32.totalorder %s4316_s16, 3 }
  0x15   : > { %s5100_s23 = scalar_select %p4446_p5, 1, 0 }
  0x16   : > { %s5102_s24 = scalar_select %p4450_p6, 1, 0 }
  0x17   : > { %5101 = sst [smem:[#allocation22_spill]] %s5100_s23  ;;  %p5084_p9 = scmp.eq.s32.totalorder %s4429_s17, 0 }
  0x18   : > { %5103 = sst [smem:[#allocation23_spill]] %s5102_s24  ;;  %p4457_p10 = pnand %p3394_p7, %p360_p8 }
  0x19   : > { %s4318_s26 = smov [#allocation5]   ;;  %s4319_s18 = smov [#allocation8]  }
  0x1a   : > { %s5104_s25 = scalar_select %p4457_p10, 1, 0 }
  0x1b   : > { %p3944_p11 = pneg %p4457_p10  ;;  %s394_s27 = sshll.u32 %s4318_s26, 4  ;;  %s4463_s27 = int_to_ptr.vmem [resolvable:$true] %s394_s27 }
  0x1c   : > { %s426_s20 = sshll.u32 %s4319_s18, 4  ;;  %s4320_s21 = smov [#allocation2]   ;;  %s4471_s20 = int_to_ptr.vmem [resolvable:$true] %s426_s20 }
  0x1d   : > { %p4467_p12 = pnand %p5084_p9, %p3944_p11  ;;  %s4473_s22 = sshll.u32 %s4320_s21, 4  ;;  %s379_s22 = int_to_ptr.vmem [resolvable:$true] %s4473_s22 }
  0x1e   : > { %s5106_s5 = sld [smem:[#allocation24_spill]] }
  0x1f   : > { %p4483_p0 = pneg %p4467_p12 }
  0x24   : > { %s4102_s24 = scalar_lea.hbm %s5106_s5, 64 }
  0x25   : > { %p4103_p13 = scmp.ne.s32.totalorder %s5106_s5, %s4102_s24  ;;  %p4109_p3 = scmp.lt.u32.totalorder %s4102_s24, %s5106_s5 }
  0x27   : > { %p4105_p1 = pnand %p4483_p0, %p4103_p13 }
  0x29   : > { %p4106_p2 = pneg %p4105_p1 }
  0x2b   : > { %p4111_p4 = pnand %p4109_p3, %p4106_p2 }
  0x2d   : > { %4114 = shalt.err (!%p4111_p4)
}
  0x2e   : > { %s4115_s29 = scalar_lea.vmem %s4463_s27, 64  ;;  %p4123_p9 = scmp.lt.s32.totalorder %s4463_s27, %s4463_s27 }
  0x2f   : > { %p4116_p7 = scmp.ne.s32.totalorder %s4463_s27, %s4115_s29  ;;  %p4124_p6 = scmp.lt.s32.totalorder %s4115_s29, %s4115_s29 }
  0x31   : > { %p4118_p8 = pnand %p4116_p7, %p4483_p0  ;;  %p4125_p13 = por %p4124_p6, %p4123_p9 }
  0x33   : > { %p4119_p11 = pneg %p4118_p8 }
  0x35   : > { %p4126_p1 = pnand %p4125_p13, %p4119_p11 }
  0x37   : > { %4129 = shalt.err (!%p4126_p1)
}
  0x38   : > { %s4321_s15 = smov 16   ;;  %s4322_s19 = smov 1  }
  0x39   : > { %3950 = dma.hbm_to_vmem [thread:$0]  (!%p4467_p12), %s5106_s5, 64, %s4463_s27, [#allocation6], %s4321_s15, %s4321_s15, %s4322_s19  }
  0x3a   : > { %s4130_s29 = scalar_lea.hbm %s5072_s9, 64 }
  0x3b   : > { %p4131_p6 = scmp.ne.s32.totalorder %s5072_s9, %s4130_s29  ;;  %p4137_p3 = scmp.lt.u32.totalorder %s4130_s29, %s5072_s9 }
  0x3d   : > { %p4133_p9 = pnand %p4131_p6, %p4483_p0 }
  0x3f   : > { %p4134_p2 = pneg %p4133_p9 }
  0x41   : > { %p4139_p4 = pnand %p4137_p3, %p4134_p2 }
  0x43   : > { %4142 = shalt.err (!%p4139_p4)
}
  0x44   : > { %s4143_s27 = scalar_lea.vmem %s4471_s20, 64  ;;  %p4151_p13 = scmp.lt.s32.totalorder %s4471_s20, %s4471_s20 }
  0x45   : > { %p4144_p7 = scmp.ne.s32.totalorder %s4471_s20, %s4143_s27  ;;  %p4152_p1 = scmp.lt.s32.totalorder %s4143_s27, %s4143_s27 }
  0x47   : > { %p4146_p8 = pnand %p4144_p7, %p4483_p0  ;;  %p4153_p6 = por %p4152_p1, %p4151_p13 }
  0x49   : > { %p4147_p11 = pneg %p4146_p8 }
  0x4b   : > { %p4154_p9 = pnand %p4153_p6, %p4147_p11 }
  0x4d   : > { %4157 = shalt.err (!%p4154_p9)
}
  0x4e   : > { %3956 = dma.hbm_to_vmem [thread:$0]  (!%p4467_p12), %s5072_s9, 64, %s4471_s20, [#allocation9], %s4321_s15, %s4321_s15, %s4322_s19  }
  0x4f   : > { %s4158_s24 = scalar_lea.hbm %s5066_s3, 64 }
  0x50   : > { %p4159_p2 = scmp.ne.s32.totalorder %s5066_s3, %s4158_s24  ;;  %p4165_p7 = scmp.lt.u32.totalorder %s4158_s24, %s5066_s3 }
  0x52   : > { %p4161_p3 = pnand %p4159_p2, %p4483_p0 }
  0x54   : > { %p4162_p4 = pneg %p4161_p3 }
  0x56   : > { %p4167_p8 = pnand %p4165_p7, %p4162_p4 }
  0x58   : > { %4170 = shalt.err (!%p4167_p8)
}
  0x59   : > { %s4171_s27 = scalar_lea.vmem %s379_s22, 64  ;;  %p4179_p6 = scmp.lt.s32.totalorder %s379_s22, %s379_s22 }
  0x5a   : > { %p4172_p11 = scmp.ne.s32.totalorder %s379_s22, %s4171_s27  ;;  %p4180_p9 = scmp.lt.s32.totalorder %s4171_s27, %s4171_s27 }
  0x5c   : > { %p4174_p13 = pnand %p4172_p11, %p4483_p0  ;;  %p4181_p5 = por %p4180_p9, %p4179_p6 }
  0x5e   : > { %p4175_p1 = pneg %p4174_p13 }
  0x60   : > { %p4182_p10 = pnand %p4181_p5, %p4175_p1 }
  0x62   : > { %4185 = shalt.err (!%p4182_p10)
}
  0x63   : > { %3947 = dma.hbm_to_vmem [thread:$0]  (!%p4467_p12), %s5066_s3, 64, %s379_s22, [#allocation3], %s4321_s15, %s4321_s15, %s4322_s19  }
  0x64   : > { %s4323_s14 = smov [#allocation7]   ;;  %s4324_s23 = smov [#allocation10]  }
  0x65   : > { %s410_s30 = sshll.u32 %s4323_s14, 4  ;;  %s445_s24 = sshll.u32 %s4324_s23, 4  ;;  %s411_s30 = int_to_ptr.vmem [resolvable:$true] %s410_s30  ;;  %s446_s24 = int_to_ptr.vmem [resolvable:$true] %s445_s24 }
  0x66   : > { %s4186_s21 = scalar_lea.hbm %s5070_s7, 64 }
  0x67   : > { %p4187_p5 = scmp.ne.s32.totalorder %s5070_s7, %s4186_s21  ;;  %p4193_p3 = scmp.lt.u32.totalorder %s4186_s21, %s5070_s7 }
  0x69   : > { %p4189_p10 = pnand %p4187_p5, %p4483_p0 }
  0x6b   : > { %p4190_p2 = pneg %p4189_p10 }
  0x6d   : > { %p4195_p4 = pnand %p4193_p3, %p4190_p2 }
  0x6f   : > { %4198 = shalt.err (!%p4195_p4)
}
  0x70   : > { %s4199_s22 = scalar_lea.vmem %s411_s30, 64  ;;  %p4207_p13 = scmp.lt.s32.totalorder %s411_s30, %s411_s30 }
  0x71   : > { %p4200_p7 = scmp.ne.s32.totalorder %s411_s30, %s4199_s22  ;;  %p4208_p1 = scmp.lt.s32.totalorder %s4199_s22, %s4199_s22 }
  0x73   : > { %p4202_p8 = pnand %p4200_p7, %p4483_p0  ;;  %p4209_p6 = por %p4208_p1, %p4207_p13 }
  0x75   : > { %p4203_p11 = pneg %p4202_p8 }
  0x77   : > { %p4210_p9 = pnand %p4209_p6, %p4203_p11 }
  0x79   : > { %4213 = shalt.err (!%p4210_p9)
}
  0x7a   : > { %3953 = dma.hbm_to_vmem [thread:$0]  (!%p4467_p12), %s5070_s7, 64, %s411_s30, [#allocation6], %s4321_s15, %s4321_s15, %s4322_s19  }
  0x7b   : > { %s4214_s26 = scalar_lea.hbm %s5075_s12, 256 }
  0x7c   : > { %p4215_p5 = scmp.ne.s32.totalorder %s5075_s12, %s4214_s26  ;;  %p4221_p3 = scmp.lt.u32.totalorder %s4214_s26, %s5075_s12 }
  0x7e   : > { %p4217_p10 = pnand %p4215_p5, %p4483_p0 }
  0x80   : > { %p4218_p2 = pneg %p4217_p10 }
  0x82   : > { %p4223_p4 = pnand %p4221_p3, %p4218_p2 }
  0x84   : > { %4226 = shalt.err (!%p4223_p4)
}
  0x85   : > { %s4227_s20 = scalar_lea.vmem %s446_s24, 256  ;;  %p4235_p13 = scmp.lt.s32.totalorder %s446_s24, %s446_s24 }
  0x86   : > { %p4228_p7 = scmp.ne.s32.totalorder %s446_s24, %s4227_s20  ;;  %p4236_p1 = scmp.lt.s32.totalorder %s4227_s20, %s4227_s20 }
  0x88   : > { %p4230_p8 = pnand %p4228_p7, %p4483_p0  ;;  %p4237_p6 = por %p4236_p1, %p4235_p13 }
  0x8a   : > { %p4231_p11 = pneg %p4230_p8 }
  0x8c   : > { %p4238_p9 = pnand %p4237_p6, %p4231_p11 }
  0x8e   : > { %4241 = shalt.err (!%p4238_p9)
}
  0x8f   : > { %s4325_s15 = smov 64   ;;  %s4326_s19 = smov 4  }
  0x90   : > { %3959 = dma.hbm_to_vmem [thread:$0]  (!%p4467_p12), %s5075_s12, 256, %s446_s24, [#allocation9], %s4325_s15, %s4325_s15, %s4326_s19  }
  0x91   : > { %p5108_p5 = scmp.ne.s32.totalorder %s5104_s25, 0 }
  0x92   : > { %p5109_p10 = scmp.eq.s32.totalorder (!%p5108_p5), %s4429_s17, 0 }
  0x93   : > { %472 = sbr.rel (%p5108_p5) target bundleno = 6761 (0x1a69), region = 76 }
  0x9a   : > { %4287 = dma.done.wait (%p5109_p10), [#allocation3], 64   ;;  %p5110_p0 = pmov %p5109_p10 }
  0x9c   : > { %4289 = vsyncadd (%p5110_p0), [#allocation3], 4294967232  ;;  %p5111_p2 = pmov %p5110_p0 }
  0x9d   : > { %p5112_p3 = pmov %p5110_p0 }
  0x9e   : > { %4291 = dma.done.wait (%p5111_p2), [#allocation6], 128  }
  0x9f   : > { %4293 = vsyncadd (%p5112_p3), [#allocation6], 4294967168  ;;  %p5113_p4 = pmov %p5110_p0 }
  0xa0   : > { %p5114_p12 = pmov %p5110_p0 }
  0xa1   : > { %4295 = dma.done.wait (%p5113_p4), [#allocation9], 320  }
  0xa2   : > { %4297 = vsyncadd (%p5114_p12), [#allocation9], 4294966976  ;;  %p534_p7 = scmp.lt.s32.totalorder %s4429_s17, 1  ;;  %v4327_v0 = vmov 0.0   ;;  %vm4328_vm0 = vmmov 0   ;;  %v4021_v1 = vld [vmem:[%s5065_s2] sm:$0xff]  }
  0xa3   : > { %3632 = vmatprep.subr.bf16.mxu0 %v4327_v0  ;;  %3636 = vmatprep.mubr.msk.bf16.mxu0 %vm4328_vm0, %v4327_v0  ;;  %v4022_v2 = vld [vmem:[%s5065_s2 + $0x8] sm:$0xff]   ;;  %vm570_vm1 = vcmask 261120   ;;  %v616_v4 = vld [vmem:[%s5067_s4] sm:$0xf]  ;;  %vm628_vm2 = vcmask 1043456   ;;  %vm624_vm3 = vcmask 64512  }
  0xa4   : > { %s535_s16 = scalar_select %p534_p7, %s4429_s17, 1  ;;  %3640 = vmatprep.subr.bf16.mxu1 %v4327_v0  ;;  %3642 = vmatprep.mubr.msk.bf16.mxu1 %vm4328_vm0, %v4327_v0  ;;  %v725_v5 = vld [vmem:[%s5071_s8] sm:$0xf]  ;;  %v630_v6 = vsel %vm628_vm2, %v616_v4, 0  ;;  %v3415_v18 = vld [vmem:[#allocation5] ss:$0 sm:$0xff] }
  0xa5   : > { %3633 = vmatpush3.bf16.msra.mxu0 %v4021_v1  ;;  %v734_v7 = vsel %vm628_vm2, %v725_v5, 0  ;;  %3641 = vmatpush3.bf16.msra.mxu1 %v630_v6  ;;  %v3410_v8 = vld [vmem:[#allocation2] ss:$0 sm:$0xff]  ;;  %v3419_v20 = vld [vmem:[#allocation8] ss:$0 sm:$0xff]  ;;  %vm783_vm4 = vcmask 31744  }
  0xa6   : > { %s3532_s25 = sshll.u32 %s535_s16, 3  ;;  %3634 = vmatprep.subr.bf16.mxu0 %v4327_v0  ;;  %3646 = vmatprep.subr.bf16.mxu1 %v4327_v0  ;;  %v673_v12 = vld [vmem:[%s5069_s6] sm:$0xf]  ;;  %v3417_v36 = vld [vmem:[#allocation7] ss:$0 sm:$0xff]  ;;  %s4329_s19 = smov 124  }
  0xa7   : > { %s4622_s14 = scalar_lea.vmem %s5063_s0, %s3532_s25  ;;  %v682_v17 = vsel %vm628_vm2, %v673_v12, 0  ;;  %vm831_vm5 = vcmask 130048   ;;  %vm1032_vm6 = vcmask 1041408   ;;  %s5115_s30 = sld [smem:[#allocation17_spill]] }
  0xa8   : > { %v4629_v3 = vld [vmem:[%s4622_s14] sm:$0xff]   ;;  %s5116_s5 = sld [smem:[#allocation25_spill]]  ;;  %s3533_s23 = sshll.u32 %s4429_s17, 8 }
  0xa9   : > { %3635 = vmatpush3.bf16.msra.mxu0 %v4022_v2  ;;  %s5117_s13 = sld [smem:[#allocation22_spill]]  ;;  %s5118_s27 = sld [smem:[#allocation26_spill]] }
  0xaa   : > { %3652 = vmatprep.subr.bf16.mxu0 %v4327_v0  ;;  %s4330_s15 = smov [#allocation11]  }
  0xac   : > { %3637 = vmatmul.mubr.msk.bf16.vlgmr.msra.gmra.mrb[0].mxu0 %vm570_vm1, %v4629_v3 }
  0xad   : > { %3654 = vmatprep.mubr.msk.bf16.mxu0 %vm4328_vm0, %v4327_v0  ;;  %3653 = vmatpush3.bf16.msra.mxu0 %v734_v7  ;;  %s531_s25 = sand.u32 1, %s5115_s30   ;;  %s4246_s30 = sshll.u32 %s4330_s15, 4  ;;  %s4247_s30 = int_to_ptr.vmem [resolvable:$false] %s4246_s30 }
  0xae   : > { %3664 = vmatprep.subr.bf16.mxu0 %v4327_v0  ;;  %s3407_s28 = sshll.u32 %s531_s25, 4  ;;  %s5022_s17 = scalar_lea.sflag [#allocation4], %s531_s25 }
  0xaf   : > { %s533_s26 = scalar_lea.vmem [#allocation11], %s3407_s28  ;;  %s5016_s20 = scalar_lea.hbm %s5118_s27, %s3533_s23 }
  0xb0   : > { %s3281_s18 = sshll.u32 %s533_s26, 4  ;;  %p5119_p11 = scmp.ne.s32.totalorder %s5117_s13, 0  ;;  %s5018_s18 = int_to_ptr.vmem [resolvable:$true] %s3281_s18 }
  0xb1   : > { %s4248_s22 = scalar_lea.vmem %s4247_s30, 512  ;;  %p4249_p6 = scmp.lt.s32.totalorder %s5018_s18, %s4247_s30 }
 0x17f   : > { %v608_v9 = vpop.f32.mrb[0].mxu0 }
 0x180   : > { %v3638_v10 = vpop.f32.mrb[1].mxu0  ;;  %v609_v13 = vadd.f32 %v3410_v8, %v608_v9 }
 0x181   : > { %v611_v11 = vpop.f32.mrb[2].mxu0 }
 0x182   : > { %v612_v14 = vadd.f32 %v3410_v8, %v611_v11  ;;  %v3639_v15 = vpop.f32.mrb[3].mxu0 }
 0x184   : > { %v615_v16 = vpack.c.bf16 %v612_v14, %v609_v13 }
 0x186   : > { %3643 = vmatmul.mubr.msk.bf16.vlgmr.msra.gmra.mrb[0].mxu1 %vm624_vm3, %v615_v16  ;;  %3655 = vmatmul.mubr.msk.bf16.vlgmr.msra.gmra.mrb[4].mxu0 %vm624_vm3, %v615_v16 }
 0x187   : > { %3647 = vmatpush3.bf16.msra.mxu1 %v682_v17  ;;  %3648 = vmatprep.mubr.msk.bf16.mxu1 %vm4328_vm0, %v4327_v0 }
 0x188   : > { %3658 = vmatprep.subr.bf16.mxu1 %v4327_v0  ;;  %3666 = vmatprep.mubr.msk.bf16.mxu0 %vm4328_vm0, %v4327_v0 }
 0x18e   : > { %3649 = vmatmul.mubr.msk.bf16.vlgmr.msra.gmra.mrb[4].mxu1 %vm624_vm3, %v615_v16 }
 0x18f   : > { %3660 = vmatprep.mubr.msk.bf16.mxu1 %vm4328_vm0, %v4327_v0 }
 0x259   : > { %v666_v19 = vpop.f32.mrb[0].mxu1  ;;  %v770_v21 = vpop.f32.mrb[4].mxu0 }
 0x25a   : > { %v667_v22 = vadd.f32 %v3415_v18, %v666_v19  ;;  %v3644_v23 = vpop.f32.mrb[1].mxu1  ;;  %v3656_v24 = vpop.f32.mrb[5].mxu0  ;;  %v771_v27 = vadd.f32 %v3419_v20, %v770_v21 }
 0x25b   : > { %v669_v25 = vpop.f32.mrb[2].mxu1  ;;  %v773_v26 = vpop.f32.mrb[6].mxu0 }
 0x25c   : > { %v670_v28 = vadd.f32 %v3415_v18, %v669_v25  ;;  %v774_v29 = vadd.f32 %v3419_v20, %v773_v26  ;;  %v3645_v30 = vpop.f32.mrb[3].mxu1  ;;  %v3657_v31 = vpop.f32.mrb[7].mxu0  ;;  %v777_v32 = vmul.f32 0.35355338, %v667_v22 }
 0x25d   : > { %v782_v30 = vld [vmem:[%s5073_s10] sm:$0xf] }
 0x25e   : > { %v778_v33 = vmul.f32 0.35355338, %v670_v28  ;;  %v4660_v34 = vpack.c.bf16 %v774_v29, %v771_v27 }
 0x260   : > { %v779_v35 = vpack.c.bf16 %v778_v33, %v777_v32  ;;  %3665 = vmatpush3.bf16.msra.mxu0 %v4660_v34 }
 0x261   : > { %v718_v37 = vpop.f32.mrb[4].mxu1  ;;  %3676 = vmatprep.subr.bf16.mxu0 %v4327_v0 }
 0x262   : > { %v3650_v38 = vpop.f32.mrb[5].mxu1  ;;  %v719_v40 = vadd.f32 %v3417_v36, %v718_v37 }
 0x263   : > { %v721_v39 = vpop.f32.mrb[6].mxu1 }
 0x264   : > { %v722_v41 = vadd.f32 %v3417_v36, %v721_v39  ;;  %v3651_v42 = vpop.f32.mrb[7].mxu1 }
 0x266   : > { %v780_v43 = vpack.c.bf16 %v722_v41, %v719_v40 }
 0x268   : > { %904 = vrot.lane.b32.xlu0 %v780_v43, %s4329_s19  ;;  %v788_v44 = vsel %vm783_vm4, %v780_v43, 0 }
 0x269   : > { %3659 = vmatpush3.bf16.xpose.msra.mxu1 %v788_v44 }
 0x26a   : > { %3670 = vmatprep.subr.bf16.mxu1 %v4327_v0 }
 0x26c   : > { %901 = vrot.lane.b32.xlu0 %v779_v35, %s4329_s19 }
 0x270   : > { %3661 = vmatmul.mubr.msk.bf16.vlgmr.msra.gmra.mrb[8].mxu1 %vm783_vm4, %v779_v35  ;;  %v3425_v35 = vcombine.low %v782_v30, %v782_v30 }
 0x271   : > { %3672 = vmatprep.mubr.msk.bf16.mxu1 %vm4328_vm0, %v4327_v0 }
 0x272   : > { %v1028_v36 = vrot.slane %v3425_v35, 2 }
 0x274   : > { %v1034_v37 = vsel %vm1032_vm6, %v1028_v36, 0 }
 0x2da   : > { %v905_v45 = vpop.permute.xlu0 %904 }
 0x2db   : > { %v910_v46 = vsel %vm783_vm4, %v905_v45, 0 }
 0x2dc   : > { %3671 = vmatpush3.bf16.xpose.msra.mxu1 %v910_v46  ;;  %v4025_v46 = vld [vmem:[%s5065_s2 + $0x10] sm:$0xff]  }
 0x2dd   : > { %3682 = vmatprep.subr.bf16.mxu1 %v4327_v0 }
 0x2de   : > { %v902_v47 = vpop.permute.xlu0 %901 }
 0x2e3   : > { %3673 = vmatmul.mubr.msk.bf16.vlgmr.msra.gmra.mrb[12].mxu1 %vm783_vm4, %v902_v47 }
 0x2e4   : > { %3684 = vmatprep.mubr.msk.bf16.mxu1 %vm4328_vm0, %v4327_v0  ;;  %3683 = vmatpush3.bf16.msra.mxu1 %v1034_v37 }
 0x2e5   : > { %3694 = vmatprep.subr.bf16.mxu1 %v4327_v0 }
 0x343   : > { %v824_v48 = vpop.f32.mrb[8].mxu1 }
 0x344   : > { %v3662_v49 = vpop.f32.mrb[9].mxu1  ;;  %v832_v50 = vsel %vm831_vm5, %v824_v48, -inf }
 0x345   : > { %833 = vmax.xlane.f32.xlu1 %v832_v50  ;;  %v827_v51 = vpop.f32.mrb[10].mxu1  ;;  %v4026_v49 = vld [vmem:[%s5065_s2 + $0x18] sm:$0xff]  }
 0x346   : > { %v3663_v52 = vpop.f32.mrb[11].mxu1  ;;  %v835_v53 = vsel %vm831_vm5, %v827_v51, -inf }
 0x349   : > { %836 = vmax.xlane.f32.xlu1 %v835_v53 }
 0x3b6   : > { %v946_v54 = vpop.f32.mrb[12].mxu1 }
 0x3b7   : > { %v3674_v55 = vpop.f32.mrb[13].mxu1  ;;  %v953_v56 = vsel %vm831_vm5, %v946_v54, -inf }
 0x3b8   : > { %954 = vmax.xlane.f32.xlu0 %v953_v56  ;;  %v949_v57 = vpop.f32.mrb[14].mxu1 }
 0x3b9   : > { %v3675_v58 = vpop.f32.mrb[15].mxu1  ;;  %v956_v59 = vsel %vm831_vm5, %v949_v57, -inf }
 0x3ba   : > { %957 = vmax.xlane.f32.xlu1 %v956_v59 }
 0x3d2   : > { %v834_v60 = vpop.xlane.xlu1 %833 }
 0x3d3   : > { %v838_v61 = vsub.f32 %v824_v48, %v834_v60 }
 0x3d5   : > { %v840_v62 = vmul.f32 1.442695, %v838_v61 }
 0x3d6   : > { %v837_v63 = vpop.xlane.xlu1 %836 }
 0x3d7   : > { %4037 = vpow2.f32 %v840_v62  ;;  %v839_v1 = vsub.f32 %v827_v51, %v837_v63 }
 0x3d9   : > { %v842_v2 = vmul.f32 1.442695, %v839_v1 }
 0x3db   : > { %4039 = vpow2.f32 %v842_v2 }
 0x3e1   : > { %v4038_v4 = vpop.eup %4037 }
 0x3e2   : > { %v844_v5 = vsel %vm831_vm5, %v4038_v4, 0.0 }
 0x3e3   : > { %845 = vadd.xlane.f32.xlu1 %v844_v5 }
 0x3e5   : > { %v4040_v6 = vpop.eup %4039 }
 0x3e6   : > { %v847_v7 = vsel %vm831_vm5, %v4040_v6, 0.0 }
 0x3e7   : > { %848 = vadd.xlane.f32.xlu1 %v847_v7  ;;  %v4027_v7 = vld [vmem:[%s5064_s1 + $0x8] sm:$0xff]  }
 0x445   : > { %v955_v8 = vpop.xlane.xlu0 %954 }
 0x446   : > { %v959_v9 = vsub.f32 %v946_v54, %v955_v8  ;;  %v3441_v8 = vld [vmem:[%s5067_s4 + $0x4] sm:$0xf] }
 0x447   : > { %v958_v10 = vpop.xlane.xlu1 %957 }
 0x448   : > { %v961_v11 = vmul.f32 1.442695, %v959_v9  ;;  %v960_v12 = vsub.f32 %v949_v57, %v958_v10  ;;  %v3428_v57 = vld [vmem:[%s5074_s11] ss:$0 sm:$0xff]  ;;  %v3444_v9 = vld [vmem:[%s5069_s6 + $0x4] sm:$0xf] }
 0x449   : > { %v1269_v10 = vsel %vm628_vm2, %v3441_v8, 0 }
 0x44a   : > { %4041 = vpow2.f32 %v961_v11  ;;  %v963_v13 = vmul.f32 1.442695, %v960_v12  ;;  %v1323_v11 = vsel %vm628_vm2, %v3444_v9, 0  ;;  %v3438_v12 = vld [vmem:[#allocation2 + $0x1] ss:$0 sm:$0xff] }
 0x44c   : > { %4043 = vpow2.f32 %v963_v13 }
 0x454   : > { %v4042_v14 = vpop.eup %4041 }
 0x455   : > { %v965_v15 = vsel %vm831_vm5, %v4042_v14, 0.0 }
 0x456   : > { %v4044_v16 = vpop.eup %4043  ;;  %966 = vadd.xlane.f32.xlu1 %v965_v15 }
 0x457   : > { %v968_v17 = vsel %vm831_vm5, %v4044_v16, 0.0 }
 0x45a   : > { %969 = vadd.xlane.f32.xlu1 %v968_v17 }
 0x46b   : > { %977 = vrot.lane.b32.xlu1 %v4660_v34, %s4329_s19  ;;  %v1081_v34 = vsel %vm1032_vm6, %v782_v30, 0 }
 0x470   : > { %v846_v18 = vpop.xlane.xlu1 %845 }
 0x471   : > { %4045 = vrcp.f32 %v846_v18 }
 0x474   : > { %v849_v19 = vpop.xlane.xlu1 %848 }
 0x475   : > { %4047 = vrcp.f32 %v849_v19 }
 0x47b   : > { %v4046_v20 = vpop.eup %4045 }
 0x47c   : > { %v852_v22 = vmul.f32 %v4046_v20, %v4038_v4 }
 0x47f   : > { %v4048_v21 = vpop.eup %4047 }
 0x480   : > { %v853_v23 = vmul.f32 %v4048_v21, %v4040_v6 }
 0x482   : > { %v854_v24 = vpack.c.bf16 %v853_v23, %v852_v22  ;;  %v3442_v22 = vld [vmem:[#allocation5 + $0x1] ss:$0 sm:$0xff] }
 0x484   : > { %3667 = vmatmul.mubr.msk.bf16.vlgmr.msra.gmra.mrb[8].mxu0 %vm831_vm5, %v854_v24  ;;  %v3445_v24 = vld [vmem:[#allocation7 + $0x1] ss:$0 sm:$0xff] }
 0x485   : > { %3678 = vmatprep.mubr.msk.bf16.mxu0 %vm4328_vm0, %v4327_v0 }
 0x4e3   : > { %v967_v25 = vpop.xlane.xlu1 %966 }
 0x4e4   : > { %4049 = vrcp.f32 %v967_v25 }
 0x4e7   : > { %v970_v26 = vpop.xlane.xlu1 %969 }
 0x4e8   : > { %4051 = vrcp.f32 %v970_v26 }
 0x4eb   : > { %v978_v27 = vpop.permute.xlu1 %977 }
 0x4ec   : > { %3677 = vmatpush3.bf16.msra.mxu0 %v978_v27 }
 0x4ed   : > { %3688 = vmatprep.subr.bf16.mxu0 %v4327_v0 }
 0x4ee   : > { %v4050_v28 = vpop.eup %4049 }
 0x4ef   : > { %v973_v31 = vmul.f32 %v4050_v28, %v4042_v14 }
 0x4f2   : > { %v4052_v29 = vpop.eup %4051 }
 0x4f3   : > { %v974_v32 = vmul.f32 %v4052_v29, %v4044_v16  ;;  %v3447_v16 = vld [vmem:[%s5071_s8 + $0x4] sm:$0xf] }
 0x4f4   : > { %v1377_v21 = vsel %vm628_vm2, %v3447_v16, 0 }
 0x4f5   : > { %v975_v33 = vpack.c.bf16 %v974_v32, %v973_v31 }
 0x4f7   : > { %3679 = vmatmul.mubr.msk.bf16.vlgmr.msra.gmra.mrb[12].mxu0 %vm831_vm5, %v975_v33 }
 0x4f8   : > { %3689 = vmatpush3.bf16.msra.mxu0 %v1081_v34  ;;  %3690 = vmatprep.mubr.msk.bf16.mxu0 %vm4328_vm0, %v4327_v0 }
 0x4f9   : > { %3702 = vmatprep.subr.bf16.mxu0 %v4327_v0 }
 0x557   : > { %v892_v38 = vpop.f32.mrb[8].mxu0 }
 0x558   : > { %v3668_v39 = vpop.f32.mrb[9].mxu0 }
 0x559   : > { %v895_v40 = vpop.f32.mrb[10].mxu0 }
 0x55a   : > { %v899_v41 = vpack.c.bf16 %v895_v40, %v892_v38  ;;  %v3669_v42 = vpop.f32.mrb[11].mxu0 }
 0x55c   : > { %3691 = vmatmul.mubr.msk.bf16.vlgmr.msra.gmra.mrb[16].mxu0 %vm783_vm4, %v899_v41  ;;  %v3448_v41 = vld [vmem:[#allocation8 + $0x1] ss:$0 sm:$0xff] }
 0x55d   : > { %3704 = vmatprep.mubr.msk.bf16.mxu0 %vm4328_vm0, %v4327_v0 }
 0x5ca   : > { %v1017_v43 = vpop.f32.mrb[12].mxu0 }
 0x5cb   : > { %v3680_v44 = vpop.f32.mrb[13].mxu0 }
 0x5cc   : > { %v1020_v45 = vpop.f32.mrb[14].mxu0 }
 0x5cd   : > { %v1024_v47 = vpack.c.bf16 %v1020_v45, %v1017_v43  ;;  %v3681_v48 = vpop.f32.mrb[15].mxu0 }
 0x5cf   : > { %3685 = vmatmul.mubr.msk.bf16.vlgmr.msra.gmra.mrb[16].mxu1 %vm783_vm4, %v1024_v47 }
 0x5d0   : > { %3695 = vmatpush3.bf16.msra.mxu1 %v4025_v46  ;;  %3698 = vmatprep.mubr.msk.bf16.mxu1 %vm4328_vm0, %v4327_v0 }
 0x5d1   : > { %3696 = vmatprep.subr.bf16.mxu1 %v4327_v0 }
 0x5d4   : > { %3697 = vmatpush3.bf16.msra.mxu1 %v4026_v49 }
 0x5d5   : > { %3708 = vmatprep.subr.bf16.mxu1 %v4327_v0 }
 0x5d7   : > { %3699 = vmatmul.mubr.msk.bf16.vlgmr.msra.gmra.mrb[20].mxu1 %vm570_vm1, %v4629_v3 }
 0x5d8   : > { %3710 = vmatprep.mubr.msk.bf16.mxu1 %vm4328_vm0, %v4327_v0  ;;  %3709 = vmatpush3.bf16.msra.mxu1 %v1269_v10 }
 0x5d9   : > { %3720 = vmatprep.subr.bf16.mxu1 %v4327_v0 }
 0x62f   : > { %v1117_v50 = vpop.f32.mrb[16].mxu0 }
 0x630   : > { %v3692_v51 = vpop.f32.mrb[17].mxu0 }
 0x631   : > { %v1120_v52 = vpop.f32.mrb[18].mxu0 }
 0x632   : > { %v3693_v53 = vpop.f32.mrb[19].mxu0 }
 0x6a2   : > { %v1070_v54 = vpop.f32.mrb[16].mxu1 }
 0x6a3   : > { %v1118_v55 = vadd.f32 %v1117_v50, %v1070_v54  ;;  %v3686_v56 = vpop.f32.mrb[17].mxu1 }
 0x6a4   : > { %v1073_v58 = vpop.f32.mrb[18].mxu1 }
 0x6a5   : > { %v1121_v59 = vadd.f32 %v1120_v52, %v1073_v58  ;;  %v3687_v60 = vpop.f32.mrb[19].mxu1  ;;  %v4721_v61 = vadd.f32 %v3428_v57, %v1118_v55 }
 0x6a7   : > { %v4723_v62 = vadd.f32 %v3428_v57, %v1121_v59 }
 0x6a9   : > { %v1133_v63 = vpack.c.bf16 %v4723_v62, %v4721_v61 }
 0x6aa   : > { %v1186_v1 = vpop.f32.mrb[20].mxu1 }
 0x6ab   : > { %v3700_v2 = vpop.f32.mrb[21].mxu1 }
 0x6ac   : > { %v1189_v4 = vpop.f32.mrb[22].mxu1 }
 0x6ad   : > { %v1196_v5 = vpack.c.bf16 %v1189_v4, %v1186_v1  ;;  %v3701_v6 = vpop.f32.mrb[23].mxu1 }
 0x6af   : > { %3703 = vmatpush3.bf16.msra.mxu0 %v1196_v5 }
 0x6b0   : > { %3714 = vmatprep.subr.bf16.mxu0 %v4327_v0 }
 0x6b2   : > { %3705 = vmatmul.mubr.msk.bf16.vlgmr.msra.gmra.mrb[20].mxu0 %vm831_vm5, %v4027_v7 }
 0x6b3   : > { %3716 = vmatprep.mubr.msk.bf16.mxu0 %vm4328_vm0, %v4327_v0  ;;  %3715 = vmatpush3.bf16.msra.mxu0 %v1323_v11 }
 0x6b4   : > { %3726 = vmatprep.subr.bf16.mxu0 %v4327_v0 }
 0x785   : > { %v1247_v13 = vpop.f32.mrb[20].mxu0 }
 0x786   : > { %v3706_v14 = vpop.f32.mrb[21].mxu0  ;;  %v1248_v17 = vadd.f32 %v3438_v12, %v1247_v13 }
 0x787   : > { %v1250_v15 = vpop.f32.mrb[22].mxu0 }
 0x788   : > { %v1251_v18 = vadd.f32 %v3438_v12, %v1250_v15  ;;  %v3707_v19 = vpop.f32.mrb[23].mxu0 }
 0x78a   : > { %v1254_v20 = vpack.c.bf16 %v1251_v18, %v1248_v17 }
 0x78c   : > { %3711 = vmatmul.mubr.msk.bf16.vlgmr.msra.gmra.mrb[24].mxu1 %vm624_vm3, %v1254_v20  ;;  %3717 = vmatmul.mubr.msk.bf16.vlgmr.msra.gmra.mrb[24].mxu0 %vm624_vm3, %v1254_v20 }
 0x78d   : > { %3721 = vmatpush3.bf16.msra.mxu1 %v1377_v21  ;;  %3722 = vmatprep.mubr.msk.bf16.mxu1 %vm4328_vm0, %v4327_v0 }
 0x78e   : > { %3728 = vmatprep.mubr.msk.bf16.mxu0 %vm4328_vm0, %v4327_v0  ;;  %3732 = vmatprep.subr.bf16.mxu1 %v4327_v0 }
 0x794   : > { %3723 = vmatmul.mubr.msk.bf16.vlgmr.msra.gmra.mrb[28].mxu1 %vm624_vm3, %v1254_v20 }
 0x795   : > { %3734 = vmatprep.mubr.msk.bf16.mxu1 %vm4328_vm0, %v4327_v0 }
 0x85f   : > { %v1305_v23 = vpop.f32.mrb[24].mxu1  ;;  %v1359_v25 = vpop.f32.mrb[24].mxu0 }
 0x860   : > { %v1306_v26 = vadd.f32 %v3442_v22, %v1305_v23  ;;  %v3712_v27 = vpop.f32.mrb[25].mxu1  ;;  %v3718_v28 = vpop.f32.mrb[25].mxu0  ;;  %v1360_v31 = vadd.f32 %v3445_v24, %v1359_v25 }
 0x861   : > { %v1308_v29 = vpop.f32.mrb[26].mxu1  ;;  %v1362_v30 = vpop.f32.mrb[26].mxu0 }
 0x862   : > { %v1309_v32 = vadd.f32 %v3442_v22, %v1308_v29  ;;  %v1363_v33 = vadd.f32 %v3445_v24, %v1362_v30  ;;  %v3713_v34 = vpop.f32.mrb[27].mxu1  ;;  %v3719_v35 = vpop.f32.mrb[27].mxu0  ;;  %v1420_v36 = vmul.f32 0.35355338, %v1306_v26 }
 0x864   : > { %v1421_v37 = vmul.f32 0.35355338, %v1309_v32  ;;  %v1423_v38 = vpack.c.bf16 %v1363_v33, %v1360_v31 }
 0x866   : > { %v1422_v39 = vpack.c.bf16 %v1421_v37, %v1420_v36  ;;  %1546 = vrot.lane.b32.xlu0 %v1423_v38, %s4329_s19  ;;  %v1431_v40 = vsel %vm783_vm4, %v1423_v38, 0  ;;  %v3450_v37 = vld [vmem:[%s5073_s10 + $0x4] sm:$0xf] }
 0x867   : > { %v1413_v42 = vpop.f32.mrb[28].mxu1  ;;  %3727 = vmatpush3.bf16.xpose.msra.mxu0 %v1431_v40 }
 0x868   : > { %1543 = vrot.lane.b32.xlu1 %v1422_v39, %s4329_s19  ;;  %v3724_v43 = vpop.f32.mrb[29].mxu1  ;;  %3738 = vmatprep.subr.bf16.mxu0 %v4327_v0  ;;  %v1414_v45 = vadd.f32 %v3448_v41, %v1413_v42  ;;  %v3455_v42 = vcombine.low %v3450_v37, %v3450_v37 }
 0x869   : > { %v1416_v44 = vpop.f32.mrb[30].mxu1 }
 0x86a   : > { %v1417_v46 = vadd.f32 %v3448_v41, %v1416_v44  ;;  %v3725_v47 = vpop.f32.mrb[31].mxu1  ;;  %v1722_v41 = vsel %vm1032_vm6, %v3450_v37, 0  ;;  %v1670_v43 = vrot.slane %v3455_v42, 2  ;;  %v3475_v42 = vld [vmem:[#allocation5 + $0x2] ss:$0 sm:$0xff] }
 0x86c   : > { %v1424_v48 = vpack.c.bf16 %v1417_v46, %v1414_v45  ;;  %v1675_v44 = vsel %vm1032_vm6, %v1670_v43, 0  ;;  %v1134_v46 = vld [vmem:[#allocation10] sm:$0xf] }
 0x86e   : > { %3729 = vmatmul.mubr.msk.bf16.vlgmr.msra.gmra.mrb[28].mxu0 %vm783_vm4, %v1422_v39  ;;  %3733 = vmatpush3.bf16.msra.mxu1 %v1424_v48 }
 0x86f   : > { %3740 = vmatprep.mubr.msk.bf16.mxu0 %vm4328_vm0, %v4327_v0  ;;  %3744 = vmatprep.subr.bf16.mxu1 %v4327_v0 }
 0x8d8   : > { %v1547_v49 = vpop.permute.xlu0 %1546 }
 0x8d9   : > { %v1552_v50 = vsel %vm783_vm4, %v1547_v49, 0 }
 0x8da   : > { %3739 = vmatpush3.bf16.xpose.msra.mxu0 %v1552_v50  ;;  %v1544_v51 = vpop.permute.xlu1 %1543 }
 0x8db   : > { %3750 = vmatprep.subr.bf16.mxu0 %v4327_v0 }
 0x8e1   : > { %3741 = vmatmul.mubr.msk.bf16.vlgmr.msra.gmra.mrb[32].mxu0 %vm783_vm4, %v1544_v51  ;;  %v1829_v51 = vsel %vm628_vm2, %v1134_v46, 0 }
 0x8e2   : > { %3752 = vmatprep.mubr.msk.bf16.mxu0 %vm4328_vm0, %v4327_v0  ;;  %3751 = vmatpush3.bf16.msra.mxu0 %v1675_v44  ;;  %v3478_v44 = vld [vmem:[#allocation7 + $0x2] ss:$0 sm:$0xff] }
 0x8e3   : > { %3762 = vmatprep.subr.bf16.mxu0 %v4327_v0 }
 0x941   : > { %v1467_v52 = vpop.f32.mrb[28].mxu0 }
 0x942   : > { %v3730_v53 = vpop.f32.mrb[29].mxu0  ;;  %v1474_v54 = vsel %vm831_vm5, %v1467_v52, -inf }
 0x943   : > { %1475 = vmax.xlane.f32.xlu1 %v1474_v54  ;;  %v1470_v55 = vpop.f32.mrb[30].mxu0 }
 0x944   : > { %v3731_v56 = vpop.f32.mrb[31].mxu0  ;;  %v1477_v57 = vsel %vm831_vm5, %v1470_v55, -inf }
 0x945   : > { %1478 = vmax.xlane.f32.xlu0 %v1477_v57  ;;  %v1777_v57 = vld [vmem:[#allocation10 + $0x4] sm:$0xf] }
 0x9b4   : > { %v1588_v58 = vpop.f32.mrb[32].mxu0 }
 0x9b5   : > { %v3742_v59 = vpop.f32.mrb[33].mxu0  ;;  %v1595_v60 = vsel %vm831_vm5, %v1588_v58, -inf }
 0x9b6   : > { %1596 = vmax.xlane.f32.xlu1 %v1595_v60  ;;  %v1591_v1 = vpop.f32.mrb[34].mxu0 }
 0x9b7   : > { %v3743_v2 = vpop.f32.mrb[35].mxu0  ;;  %v1598_v4 = vsel %vm831_vm5, %v1591_v1, -inf }
 0x9ba   : > { %1599 = vmax.xlane.f32.xlu1 %v1598_v4 }
 0x9d0   : > { %v1476_v5 = vpop.xlane.xlu1 %1475 }
 0x9d1   : > { %v1480_v6 = vsub.f32 %v1467_v52, %v1476_v5 }
 0x9d2   : > { %v1479_v7 = vpop.xlane.xlu0 %1478 }
 0x9d3   : > { %v1482_v8 = vmul.f32 1.442695, %v1480_v6  ;;  %v1481_v9 = vsub.f32 %v1470_v55, %v1479_v7 }
 0x9d5   : > { %4053 = vpow2.f32 %v1482_v8  ;;  %v1484_v10 = vmul.f32 1.442695, %v1481_v9  ;;  %v3459_v8 = vld [vmem:[%s5074_s11 + $0x1] ss:$0 sm:$0xff] }
 0x9d7   : > { %4055 = vpow2.f32 %v1484_v10 }
 0x9df   : > { %v4054_v11 = vpop.eup %4053 }
 0x9e0   : > { %v1486_v12 = vsel %vm831_vm5, %v4054_v11, 0.0 }
 0x9e1   : > { %v4056_v13 = vpop.eup %4055  ;;  %1487 = vadd.xlane.f32.xlu0 %v1486_v12 }
 0x9e2   : > { %v1489_v14 = vsel %vm831_vm5, %v4056_v13, 0.0 }
 0x9e3   : > { %1490 = vadd.xlane.f32.xlu1 %v1489_v14  ;;  %v4029_v14 = vld [vmem:[%s5065_s2 + $0x20] sm:$0xff]  }
 0xa43   : > { %v1597_v15 = vpop.xlane.xlu1 %1596 }
 0xa44   : > { %v1601_v16 = vsub.f32 %v1588_v58, %v1597_v15  ;;  %v1782_v58 = vsel %vm628_vm2, %v1777_v57, 0 }
 0xa46   : > { %v1603_v17 = vmul.f32 1.442695, %v1601_v16  ;;  %v4030_v16 = vld [vmem:[%s5065_s2 + $0x28] sm:$0xff]  }
 0xa47   : > { %v1600_v18 = vpop.xlane.xlu1 %1599 }
 0xa48   : > { %4057 = vpow2.f32 %v1603_v17  ;;  %v1602_v19 = vsub.f32 %v1591_v1, %v1600_v18 }
 0xa4a   : > { %v1605_v20 = vmul.f32 1.442695, %v1602_v19 }
 0xa4c   : > { %4059 = vpow2.f32 %v1605_v20 }
 0xa52   : > { %v4058_v21 = vpop.eup %4057 }
 0xa53   : > { %v1607_v22 = vsel %vm831_vm5, %v4058_v21, 0.0 }
 0xa54   : > { %1608 = vadd.xlane.f32.xlu0 %v1607_v22 }
 0xa56   : > { %v4060_v23 = vpop.eup %4059 }
 0xa57   : > { %v1610_v24 = vsel %vm831_vm5, %v4060_v23, 0.0 }
 0xa58   : > { %1611 = vadd.xlane.f32.xlu1 %v1610_v24 }
 0xa6a   : > { %1619 = vrot.lane.b32.xlu0 %v1424_v48, %s4329_s19 }
 0xa6e   : > { %v1488_v25 = vpop.xlane.xlu0 %1487 }
 0xa6f   : > { %4061 = vrcp.f32 %v1488_v25 }
 0xa70   : > { %v1491_v26 = vpop.xlane.xlu1 %1490 }
 0xa71   : > { %4063 = vrcp.f32 %v1491_v26 }
 0xa79   : > { %v4062_v27 = vpop.eup %4061 }
 0xa7a   : > { %v1494_v29 = vmul.f32 %v4062_v27, %v4054_v11 }
 0xa7b   : > { %v4064_v28 = vpop.eup %4063 }
 0xa7c   : > { %v1495_v30 = vmul.f32 %v4064_v28, %v4056_v13  ;;  %v3474_v28 = vld [vmem:[%s5067_s4 + $0x8] sm:$0xf] }
 0xa7e   : > { %v1496_v31 = vpack.c.bf16 %v1495_v30, %v1494_v29  ;;  %v3477_v29 = vld [vmem:[%s5069_s6 + $0x8] sm:$0xf]  ;;  %v2006_v30 = vsel %vm628_vm2, %v3474_v28, 0 }
 0xa80   : > { %3735 = vmatmul.mubr.msk.bf16.vlgmr.msra.gmra.mrb[32].mxu1 %vm831_vm5, %v1496_v31  ;;  %v2060_v31 = vsel %vm628_vm2, %v3477_v29, 0 }
 0xa81   : > { %3746 = vmatprep.mubr.msk.bf16.mxu1 %vm4328_vm0, %v4327_v0 }
 0xae1   : > { %v1609_v32 = vpop.xlane.xlu0 %1608 }
 0xae2   : > { %4065 = vrcp.f32 %v1609_v32  ;;  %v3471_v32 = vld [vmem:[#allocation2 + $0x2] ss:$0 sm:$0xff] }
 0xae5   : > { %v1620_v33 = vpop.permute.xlu0 %1619  ;;  %v1612_v34 = vpop.xlane.xlu1 %1611 }
 0xae6   : > { %4067 = vrcp.f32 %v1612_v34  ;;  %3745 = vmatpush3.bf16.msra.mxu1 %v1620_v33 }
 0xae7   : > { %3756 = vmatprep.subr.bf16.mxu1 %v4327_v0 }
 0xaec   : > { %v4066_v35 = vpop.eup %4065 }
 0xaed   : > { %v1615_v38 = vmul.f32 %v4066_v35, %v4058_v21 }
 0xaf0   : > { %v4068_v36 = vpop.eup %4067 }
 0xaf1   : > { %v1616_v39 = vmul.f32 %v4068_v36, %v4060_v23  ;;  %v3480_v36 = vld [vmem:[%s5071_s8 + $0x8] sm:$0xf] }
 0xaf3   : > { %v1617_v40 = vpack.c.bf16 %v1616_v39, %v1615_v38 }
 0xaf5   : > { %3747 = vmatmul.mubr.msk.bf16.vlgmr.msra.gmra.mrb[36].mxu1 %vm831_vm5, %v1617_v40 }
 0xaf6   : > { %3757 = vmatpush3.bf16.msra.mxu1 %v1722_v41  ;;  %3758 = vmatprep.mubr.msk.bf16.mxu1 %vm4328_vm0, %v4327_v0  ;;  %v2114_v41 = vsel %vm628_vm2, %v3480_v36, 0 }
 0xaf7   : > { %3768 = vmatprep.subr.bf16.mxu1 %v4327_v0 }
 0xb53   : > { %v1534_v45 = vpop.f32.mrb[32].mxu1 }
 0xb54   : > { %v3736_v47 = vpop.f32.mrb[33].mxu1 }
 0xb55   : > { %v1537_v48 = vpop.f32.mrb[34].mxu1 }
 0xb56   : > { %v1541_v49 = vpack.c.bf16 %v1537_v48, %v1534_v45  ;;  %v3737_v50 = vpop.f32.mrb[35].mxu1 }
 0xb58   : > { %3759 = vmatmul.mubr.msk.bf16.vlgmr.msra.gmra.mrb[40].mxu1 %vm783_vm4, %v1541_v49 }
 0xb59   : > { %3769 = vmatpush3.bf16.msra.mxu1 %v1829_v51  ;;  %3770 = vmatprep.mubr.msk.bf16.mxu1 %vm4328_vm0, %v4327_v0 }
 0xb5a   : > { %3782 = vmatprep.subr.bf16.mxu1 %v4327_v0 }
 0xb60   : > { %3771 = vmatmul.mubr.msk.bf16.vlgmr.msra.gmra.mrb[44].mxu1 %vm624_vm3, %v1133_v63 }
 0xb61   : > { %3784 = vmatprep.mubr.msk.bf16.mxu1 %vm4328_vm0, %v4327_v0 }
 0xbc8   : > { %v1659_v52 = vpop.f32.mrb[36].mxu1 }
 0xbc9   : > { %v3748_v53 = vpop.f32.mrb[37].mxu1 }
 0xbca   : > { %v1662_v54 = vpop.f32.mrb[38].mxu1 }
 0xbcb   : > { %v1666_v55 = vpack.c.bf16 %v1662_v54, %v1659_v52  ;;  %v3749_v56 = vpop.f32.mrb[39].mxu1 }
 0xbcd   : > { %3753 = vmatmul.mubr.msk.bf16.vlgmr.msra.gmra.mrb[36].mxu0 %vm783_vm4, %v1666_v55 }
 0xbce   : > { %3764 = vmatprep.mubr.msk.bf16.mxu0 %vm4328_vm0, %v4327_v0  ;;  %3763 = vmatpush3.bf16.msra.mxu0 %v1782_v58 }
 0xbcf   : > { %3774 = vmatprep.subr.bf16.mxu0 %v4327_v0 }
 0xc2b   : > { %v1758_v61 = vpop.f32.mrb[40].mxu1 }
 0xc2c   : > { %v3760_v62 = vpop.f32.mrb[41].mxu1 }
 0xc2d   : > { %v1761_v63 = vpop.f32.mrb[42].mxu1 }
 0xc2e   : > { %v3761_v59 = vpop.f32.mrb[43].mxu1 }
 0xc33   : > { %v1865_v60 = vpop.f32.mrb[44].mxu1 }
 0xc34   : > { %v3772_v1 = vpop.f32.mrb[45].mxu1 }
 0xc35   : > { %v1868_v2 = vpop.f32.mrb[46].mxu1 }
 0xc36   : > { %v3773_v4 = vpop.f32.mrb[47].mxu1 }
 0xca0   : > { %v1711_v5 = vpop.f32.mrb[36].mxu0 }
 0xca1   : > { %v1759_v6 = vadd.f32 %v1758_v61, %v1711_v5  ;;  %v3754_v7 = vpop.f32.mrb[37].mxu0 }
 0xca2   : > { %v1714_v9 = vpop.f32.mrb[38].mxu0 }
 0xca3   : > { %v1762_v10 = vadd.f32 %v1761_v63, %v1714_v9  ;;  %v3755_v11 = vpop.f32.mrb[39].mxu0  ;;  %v1773_v12 = vadd.f32 %v3459_v8, %v1759_v6  ;;  %v3481_v63 = vld [vmem:[#allocation8 + $0x2] ss:$0 sm:$0xff] }
 0xca5   : > { %v1774_v13 = vadd.f32 %v3459_v8, %v1762_v10 }
 0xca7   : > { %v1775_v15 = vpack.c.bf16 %v1774_v13, %v1773_v12 }
 0xca9   : > { %3765 = vmatmul.mubr.msk.bf16.vlgmr.msra.gmra.mrb[40].mxu0 %vm624_vm3, %v1775_v15 }
 0xcaa   : > { %3775 = vmatpush3.bf16.msra.mxu0 %v4029_v14  ;;  %3778 = vmatprep.mubr.msk.bf16.mxu0 %vm4328_vm0, %v4327_v0 }
 0xcab   : > { %3776 = vmatprep.subr.bf16.mxu0 %v4327_v0 }
 0xcae   : > { %3777 = vmatpush3.bf16.msra.mxu0 %v4030_v16 }
 0xcaf   : > { %3788 = vmatprep.subr.bf16.mxu0 %v4327_v0 }
 0xcb1   : > { %3779 = vmatmul.mubr.msk.bf16.vlgmr.msra.gmra.mrb[44].mxu0 %vm570_vm1, %v4629_v3  ;;  %v4031_v3 = vld [vmem:[%s5064_s1 + $0x10] sm:$0xff]  }
 0xcb2   : > { %3790 = vmatprep.mubr.msk.bf16.mxu0 %vm4328_vm0, %v4327_v0  ;;  %3789 = vmatpush3.bf16.msra.mxu0 %v2006_v30 }
 0xcb3   : > { %3800 = vmatprep.subr.bf16.mxu0 %v4327_v0 }
 0xd7c   : > { %v1818_v17 = vpop.f32.mrb[40].mxu0 }
 0xd7d   : > { %v4828_v18 = vadd.f32 %v1865_v60, %v1818_v17  ;;  %v3766_v19 = vpop.f32.mrb[41].mxu0 }
 0xd7e   : > { %v1821_v20 = vpop.f32.mrb[42].mxu0 }
 0xd7f   : > { %v4830_v21 = vadd.f32 %v1868_v2, %v1821_v20  ;;  %v3767_v22 = vpop.f32.mrb[43].mxu0 }
 0xd84   : > { %v1923_v23 = vpop.f32.mrb[44].mxu0 }
 0xd85   : > { %v3780_v24 = vpop.f32.mrb[45].mxu0 }
 0xd86   : > { %v1926_v25 = vpop.f32.mrb[46].mxu0 }
 0xd87   : > { %v1933_v26 = vpack.c.bf16 %v1926_v25, %v1923_v23  ;;  %v3781_v27 = vpop.f32.mrb[47].mxu0 }
 0xd89   : > { %3783 = vmatpush3.bf16.msra.mxu1 %v1933_v26 }
 0xd8a   : > { %3794 = vmatprep.subr.bf16.mxu1 %v4327_v0 }
 0xd8c   : > { %3785 = vmatmul.mubr.msk.bf16.vlgmr.msra.gmra.mrb[48].mxu1 %vm831_vm5, %v4031_v3 }
 0xd8d   : > { %3796 = vmatprep.mubr.msk.bf16.mxu1 %vm4328_vm0, %v4327_v0  ;;  %3795 = vmatpush3.bf16.msra.mxu1 %v2060_v31 }
 0xd8e   : > { %3806 = vmatprep.subr.bf16.mxu1 %v4327_v0 }
 0xe5f   : > { %v1984_v33 = vpop.f32.mrb[48].mxu1 }
 0xe60   : > { %v3786_v34 = vpop.f32.mrb[49].mxu1  ;;  %v1985_v37 = vadd.f32 %v3471_v32, %v1984_v33 }
 0xe61   : > { %v1987_v35 = vpop.f32.mrb[50].mxu1 }
 0xe62   : > { %v1988_v38 = vadd.f32 %v3471_v32, %v1987_v35  ;;  %v3787_v39 = vpop.f32.mrb[51].mxu1 }
 0xe64   : > { %v1991_v40 = vpack.c.bf16 %v1988_v38, %v1985_v37 }
 0xe66   : > { %3791 = vmatmul.mubr.msk.bf16.vlgmr.msra.gmra.mrb[48].mxu0 %vm624_vm3, %v1991_v40  ;;  %3797 = vmatmul.mubr.msk.bf16.vlgmr.msra.gmra.mrb[52].mxu1 %vm624_vm3, %v1991_v40 }
 0xe67   : > { %3801 = vmatpush3.bf16.msra.mxu0 %v2114_v41  ;;  %3802 = vmatprep.mubr.msk.bf16.mxu0 %vm4328_vm0, %v4327_v0 }
 0xe68   : > { %3808 = vmatprep.mubr.msk.bf16.mxu1 %vm4328_vm0, %v4327_v0  ;;  %3812 = vmatprep.subr.bf16.mxu0 %v4327_v0 }
 0xe6e   : > { %3803 = vmatmul.mubr.msk.bf16.vlgmr.msra.gmra.mrb[52].mxu0 %vm624_vm3, %v1991_v40 }
 0xe6f   : > { %3814 = vmatprep.mubr.msk.bf16.mxu0 %vm4328_vm0, %v4327_v0 }
 0xf39   : > { %v2042_v43 = vpop.f32.mrb[48].mxu0  ;;  %v2096_v45 = vpop.f32.mrb[52].mxu1 }
 0xf3a   : > { %v2043_v46 = vadd.f32 %v3475_v42, %v2042_v43  ;;  %v3792_v47 = vpop.f32.mrb[49].mxu0  ;;  %v3798_v48 = vpop.f32.mrb[53].mxu1  ;;  %v2097_v51 = vadd.f32 %v3478_v44, %v2096_v45 }
 0xf3b   : > { %v2045_v49 = vpop.f32.mrb[50].mxu0  ;;  %v2099_v50 = vpop.f32.mrb[54].mxu1 }
 0xf3c   : > { %v2046_v52 = vadd.f32 %v3475_v42, %v2045_v49  ;;  %v2100_v53 = vadd.f32 %v3478_v44, %v2099_v50  ;;  %v3793_v54 = vpop.f32.mrb[51].mxu0  ;;  %v3799_v55 = vpop.f32.mrb[55].mxu1  ;;  %v2157_v56 = vmul.f32 0.35355338, %v2043_v46 }
 0xf3d   : > { %v3483_v55 = vld [vmem:[%s5073_s10 + $0x8] sm:$0xf] }
 0xf3e   : > { %v2158_v57 = vmul.f32 0.35355338, %v2046_v52  ;;  %v2160_v58 = vpack.c.bf16 %v2100_v53, %v2097_v51 }
 0xf40   : > { %v2159_v61 = vpack.c.bf16 %v2158_v57, %v2157_v56  ;;  %2283 = vrot.lane.b32.xlu1 %v2160_v58, %s4329_s19  ;;  %v2168_v62 = vsel %vm783_vm4, %v2160_v58, 0 }
 0xf41   : > { %v2150_v59 = vpop.f32.mrb[52].mxu0  ;;  %3807 = vmatpush3.bf16.xpose.msra.mxu1 %v2168_v62  ;;  %v3488_v62 = vcombine.low %v3483_v55, %v3483_v55 }
 0xf42   : > { %v3804_v60 = vpop.f32.mrb[53].mxu0  ;;  %3818 = vmatprep.subr.bf16.mxu1 %v4327_v0  ;;  %v2151_v2 = vadd.f32 %v3481_v63, %v2150_v59 }
 0xf43   : > { %v2153_v1 = vpop.f32.mrb[54].mxu0 }
 0xf44   : > { %v2154_v4 = vadd.f32 %v3481_v63, %v2153_v1  ;;  %2280 = vrot.lane.b32.xlu1 %v2159_v61, %s4329_s19  ;;  %v3805_v5 = vpop.f32.mrb[55].mxu0  ;;  %v2407_v63 = vrot.slane %v3488_v62, 2 }
 0xf46   : > { %v2161_v6 = vpack.c.bf16 %v2154_v4, %v2151_v2  ;;  %v2412_v59 = vsel %vm1032_vm6, %v2407_v63, 0  ;;  %v4033_v4 = vld [vmem:[%s5065_s2 + $0x30] sm:$0xff]  }
 0xf48   : > { %3809 = vmatmul.mubr.msk.bf16.vlgmr.msra.gmra.mrb[56].mxu1 %vm783_vm4, %v2159_v61  ;;  %3813 = vmatpush3.bf16.msra.mxu0 %v2161_v6  ;;  %v2459_v61 = vsel %vm1032_vm6, %v3483_v55, 0 }
 0xf49   : > { %3820 = vmatprep.mubr.msk.bf16.mxu1 %vm4328_vm0, %v4327_v0  ;;  %3824 = vmatprep.subr.bf16.mxu0 %v4327_v0 }
 0xfb2   : > { %v2284_v7 = vpop.permute.xlu1 %2283 }
 0xfb3   : > { %v2289_v8 = vsel %vm783_vm4, %v2284_v7, 0  ;;  %v4034_v7 = vld [vmem:[%s5065_s2 + $0x38] sm:$0xff]  }
 0xfb4   : > { %3819 = vmatpush3.bf16.xpose.msra.mxu1 %v2289_v8  ;;  %v4101_v8 = vld [vmem:[%s4622_s14] sm:$0xff]  }
 0xfb5   : > { %3830 = vmatprep.subr.bf16.mxu1 %v4327_v0 }
 0xfb6   : > { %v2281_v9 = vpop.permute.xlu1 %2280 }
 0xfbb   : > { %3821 = vmatmul.mubr.msk.bf16.vlgmr.msra.gmra.mrb[60].mxu1 %vm783_vm4, %v2281_v9 }
 0xfbc   : > { %3832 = vmatprep.mubr.msk.bf16.mxu1 %vm4328_vm0, %v4327_v0  ;;  %3831 = vmatpush3.bf16.msra.mxu1 %v2412_v59 }
 0xfbd   : > { %3842 = vmatprep.subr.bf16.mxu1 %v4327_v0 }
0x101b   : > { %v2204_v10 = vpop.f32.mrb[56].mxu1 }
0x101c   : > { %v3810_v11 = vpop.f32.mrb[57].mxu1  ;;  %v2211_v12 = vsel %vm831_vm5, %v2204_v10, -inf }
0x101d   : > { %2212 = vmax.xlane.f32.xlu0 %v2211_v12  ;;  %v2207_v13 = vpop.f32.mrb[58].mxu1 }
0x101e   : > { %v3811_v14 = vpop.f32.mrb[59].mxu1  ;;  %v2214_v15 = vsel %vm831_vm5, %v2207_v13, -inf }
0x101f   : > { %2215 = vmax.xlane.f32.xlu1 %v2214_v15  ;;  %v2514_v14 = vld [vmem:[#allocation10 + $0x8] sm:$0xf] }
0x1020   : > { %v2519_v15 = vsel %vm628_vm2, %v2514_v14, 0 }
0x108e   : > { %v2325_v16 = vpop.f32.mrb[60].mxu1 }
0x108f   : > { %v3822_v17 = vpop.f32.mrb[61].mxu1  ;;  %v2332_v19 = vsel %vm831_vm5, %v2325_v16, -inf }
0x1090   : > { %2333 = vmax.xlane.f32.xlu0 %v2332_v19  ;;  %v2328_v20 = vpop.f32.mrb[62].mxu1 }
0x1091   : > { %v3823_v22 = vpop.f32.mrb[63].mxu1  ;;  %v2335_v23 = vsel %vm831_vm5, %v2328_v20, -inf }
0x1094   : > { %2336 = vmax.xlane.f32.xlu0 %v2335_v23 }
0x10aa   : > { %v2213_v24 = vpop.xlane.xlu0 %2212 }
0x10ab   : > { %v2217_v25 = vsub.f32 %v2204_v10, %v2213_v24 }
0x10ac   : > { %v2216_v26 = vpop.xlane.xlu1 %2215 }
0x10ad   : > { %v2219_v27 = vmul.f32 1.442695, %v2217_v25  ;;  %v2218_v3 = vsub.f32 %v2207_v13, %v2216_v26 }
0x10af   : > { %4069 = vpow2.f32 %v2219_v27  ;;  %v2221_v28 = vmul.f32 1.442695, %v2218_v3 }
0x10b1   : > { %4071 = vpow2.f32 %v2221_v28 }
0x10b9   : > { %v4070_v29 = vpop.eup %4069 }
0x10ba   : > { %v2223_v30 = vsel %vm831_vm5, %v4070_v29, 0.0 }
0x10bb   : > { %v4072_v31 = vpop.eup %4071  ;;  %2224 = vadd.xlane.f32.xlu1 %v2223_v30 }
0x10bc   : > { %v2226_v32 = vsel %vm831_vm5, %v4072_v31, 0.0 }
0x10bd   : > { %2227 = vadd.xlane.f32.xlu0 %v2226_v32 }
0x111d   : > { %v2334_v33 = vpop.xlane.xlu0 %2333 }
0x111e   : > { %v2338_v34 = vsub.f32 %v2325_v16, %v2334_v33 }
0x1120   : > { %v2340_v35 = vmul.f32 1.442695, %v2338_v34 }
0x1121   : > { %v2337_v36 = vpop.xlane.xlu0 %2336 }
0x1122   : > { %4073 = vpow2.f32 %v2340_v35  ;;  %v2339_v37 = vsub.f32 %v2328_v20, %v2337_v36  ;;  %v4035_v36 = vld [vmem:[%s5064_s1 + $0x18] sm:$0xff]  }
0x1124   : > { %v2342_v38 = vmul.f32 1.442695, %v2339_v37  ;;  %v3506_v37 = vld [vmem:[%s5067_s4 + $0xc] sm:$0xf] }
0x1126   : > { %4075 = vpow2.f32 %v2342_v38  ;;  %v3509_v38 = vld [vmem:[%s5069_s6 + $0xc] sm:$0xf] }
0x112c   : > { %v4074_v39 = vpop.eup %4073 }
0x112d   : > { %v2344_v40 = vsel %vm831_vm5, %v4074_v39, 0.0 }
0x112e   : > { %2345 = vadd.xlane.f32.xlu1 %v2344_v40  ;;  %v2752_v40 = vsel %vm628_vm2, %v3509_v38, 0 }
0x1130   : > { %v4076_v41 = vpop.eup %4075 }
0x1131   : > { %v2347_v42 = vsel %vm831_vm5, %v4076_v41, 0.0 }
0x1132   : > { %2348 = vadd.xlane.f32.xlu0 %v2347_v42 }
0x113f   : > { %2356 = vrot.lane.b32.xlu1 %v2161_v6, %s4329_s19 }
0x1148   : > { %v2225_v43 = vpop.xlane.xlu1 %2224 }
0x1149   : > { %4077 = vrcp.f32 %v2225_v43 }
0x114a   : > { %v2228_v44 = vpop.xlane.xlu0 %2227 }
0x114b   : > { %4079 = vrcp.f32 %v2228_v44 }
0x1153   : > { %v4078_v45 = vpop.eup %4077 }
0x1154   : > { %v2231_v47 = vmul.f32 %v4078_v45, %v4070_v29  ;;  %v3492_v29 = vld [vmem:[%s5074_s11 + $0x2] ss:$0 sm:$0xff] }
0x1155   : > { %v4080_v46 = vpop.eup %4079 }
0x1156   : > { %v2232_v48 = vmul.f32 %v4080_v46, %v4072_v31 }
0x1158   : > { %v2233_v49 = vpack.c.bf16 %v2232_v48, %v2231_v47  ;;  %v3503_v47 = vld [vmem:[#allocation2 + $0x3] ss:$0 sm:$0xff] }
0x115a   : > { %3815 = vmatmul.mubr.msk.bf16.vlgmr.msra.gmra.mrb[56].mxu0 %vm831_vm5, %v2233_v49 }
0x115b   : > { %3826 = vmatprep.mubr.msk.bf16.mxu0 %vm4328_vm0, %v4327_v0 }
0x11bb   : > { %v2346_v50 = vpop.xlane.xlu1 %2345 }
0x11bc   : > { %4081 = vrcp.f32 %v2346_v50 }
0x11bf   : > { %v2349_v51 = vpop.xlane.xlu0 %2348  ;;  %v2357_v52 = vpop.permute.xlu1 %2356 }
0x11c0   : > { %4083 = vrcp.f32 %v2349_v51  ;;  %3825 = vmatpush3.bf16.msra.mxu0 %v2357_v52  ;;  %v3512_v51 = vld [vmem:[%s5071_s8 + $0xc] sm:$0xf] }
0x11c1   : > { %3836 = vmatprep.subr.bf16.mxu0 %v4327_v0 }
0x11c6   : > { %v4082_v53 = vpop.eup %4081 }
0x11c7   : > { %v2352_v56 = vmul.f32 %v4082_v53, %v4074_v39  ;;  %v2698_v39 = vsel %vm628_vm2, %v3506_v37, 0 }
0x11ca   : > { %v4084_v54 = vpop.eup %4083 }
0x11cb   : > { %v2353_v57 = vmul.f32 %v4084_v54, %v4076_v41 }
0x11cd   : > { %v2354_v58 = vpack.c.bf16 %v2353_v57, %v2352_v56  ;;  %v3510_v57 = vld [vmem:[#allocation7 + $0x3] ss:$0 sm:$0xff] }
0x11cf   : > { %3827 = vmatmul.mubr.msk.bf16.vlgmr.msra.gmra.mrb[60].mxu0 %vm831_vm5, %v2354_v58 }
0x11d0   : > { %3837 = vmatpush3.bf16.msra.mxu0 %v2459_v61  ;;  %3838 = vmatprep.mubr.msk.bf16.mxu0 %vm4328_vm0, %v4327_v0 }
0x11d1   : > { %3848 = vmatprep.subr.bf16.mxu0 %v4327_v0 }
0x122d   : > { %v2271_v60 = vpop.f32.mrb[56].mxu0 }
0x122e   : > { %v3816_v1 = vpop.f32.mrb[57].mxu0 }
0x122f   : > { %v2274_v2 = vpop.f32.mrb[58].mxu0 }
0x1230   : > { %v2278_v5 = vpack.c.bf16 %v2274_v2, %v2271_v60  ;;  %v3817_v6 = vpop.f32.mrb[59].mxu0 }
0x1232   : > { %3839 = vmatmul.mubr.msk.bf16.vlgmr.msra.gmra.mrb[64].mxu0 %vm783_vm4, %v2278_v5 }
0x1233   : > { %3849 = vmatpush3.bf16.msra.mxu0 %v4033_v4  ;;  %3852 = vmatprep.mubr.msk.bf16.mxu0 %vm4328_vm0, %v4327_v0 }
0x1234   : > { %3850 = vmatprep.subr.bf16.mxu0 %v4327_v0 }
0x1237   : > { %3851 = vmatpush3.bf16.msra.mxu0 %v4034_v7 }
0x1238   : > { %3862 = vmatprep.subr.bf16.mxu0 %v4327_v0 }
0x123a   : > { %3853 = vmatmul.mubr.msk.bf16.vlgmr.msra.gmra.mrb[68].mxu0 %vm570_vm1, %v4101_v8 }
0x123b   : > { %3864 = vmatprep.mubr.msk.bf16.mxu0 %vm4328_vm0, %v4327_v0  ;;  %3863 = vmatpush3.bf16.msra.mxu0 %v2698_v39 }
0x123c   : > { %3874 = vmatprep.subr.bf16.mxu0 %v4327_v0 }
0x12a2   : > { %v2396_v9 = vpop.f32.mrb[60].mxu0 }
0x12a3   : > { %v3828_v10 = vpop.f32.mrb[61].mxu0 }
0x12a4   : > { %v2399_v11 = vpop.f32.mrb[62].mxu0 }
0x12a5   : > { %v2403_v12 = vpack.c.bf16 %v2399_v11, %v2396_v9  ;;  %v3829_v13 = vpop.f32.mrb[63].mxu0 }
0x12a7   : > { %3833 = vmatmul.mubr.msk.bf16.vlgmr.msra.gmra.mrb[64].mxu1 %vm783_vm4, %v2403_v12  ;;  %v3513_v12 = vld [vmem:[#allocation8 + $0x3] ss:$0 sm:$0xff] }
0x12a8   : > { %3844 = vmatprep.mubr.msk.bf16.mxu1 %vm4328_vm0, %v4327_v0  ;;  %3843 = vmatpush3.bf16.msra.mxu1 %v2519_v15 }
0x12a9   : > { %3856 = vmatprep.subr.bf16.mxu1 %v4327_v0 }
0x1305   : > { %v2495_v16 = vpop.f32.mrb[64].mxu0 }
0x1306   : > { %v3840_v17 = vpop.f32.mrb[65].mxu0 }
0x1307   : > { %v2498_v19 = vpop.f32.mrb[66].mxu0 }
0x1308   : > { %v3841_v20 = vpop.f32.mrb[67].mxu0 }
0x130d   : > { %v2615_v22 = vpop.f32.mrb[68].mxu0 }
0x130e   : > { %v3854_v23 = vpop.f32.mrb[69].mxu0 }
0x130f   : > { %v2618_v24 = vpop.f32.mrb[70].mxu0 }
0x1310   : > { %v2625_v25 = vpack.c.bf16 %v2618_v24, %v2615_v22  ;;  %v3855_v26 = vpop.f32.mrb[71].mxu0 }
0x137a   : > { %v2448_v27 = vpop.f32.mrb[64].mxu1 }
0x137b   : > { %v2496_v3 = vadd.f32 %v2495_v16, %v2448_v27  ;;  %v3834_v28 = vpop.f32.mrb[65].mxu1 }
0x137c   : > { %v2451_v30 = vpop.f32.mrb[66].mxu1 }
0x137d   : > { %v2499_v31 = vadd.f32 %v2498_v19, %v2451_v30  ;;  %v3835_v32 = vpop.f32.mrb[67].mxu1  ;;  %v2510_v33 = vadd.f32 %v3492_v29, %v2496_v3 }
0x137f   : > { %v2511_v34 = vadd.f32 %v3492_v29, %v2499_v31 }
0x1381   : > { %v2512_v35 = vpack.c.bf16 %v2511_v34, %v2510_v33 }
0x1383   : > { %3845 = vmatmul.mubr.msk.bf16.vlgmr.msra.gmra.mrb[68].mxu1 %vm624_vm3, %v2512_v35 }
0x1384   : > { %3857 = vmatpush3.bf16.msra.mxu1 %v2625_v25  ;;  %3858 = vmatprep.mubr.msk.bf16.mxu1 %vm4328_vm0, %v4327_v0 }
0x1385   : > { %3868 = vmatprep.subr.bf16.mxu1 %v4327_v0 }
0x138b   : > { %3859 = vmatmul.mubr.msk.bf16.vlgmr.msra.gmra.mrb[72].mxu1 %vm831_vm5, %v4035_v36 }
0x138c   : > { %3870 = vmatprep.mubr.msk.bf16.mxu1 %vm4328_vm0, %v4327_v0  ;;  %3869 = vmatpush3.bf16.msra.mxu1 %v2752_v40 }
0x138d   : > { %3880 = vmatprep.subr.bf16.mxu1 %v4327_v0 }
0x1456   : > { %v2555_v41 = vpop.f32.mrb[68].mxu1 }
0x1457   : > { %v4943_v42 = vadd.f32 %v2555_v41, %v4828_v18  ;;  %v3846_v43 = vpop.f32.mrb[69].mxu1  ;;  %v2806_v18 = vsel %vm628_vm2, %v3512_v51, 0 }
0x1458   : > { %v2558_v44 = vpop.f32.mrb[70].mxu1 }
0x1459   : > { %v4946_v45 = vadd.f32 %v2558_v44, %v4830_v21  ;;  %v3847_v46 = vpop.f32.mrb[71].mxu1  ;;  %v3507_v21 = vld [vmem:[#allocation5 + $0x3] ss:$0 sm:$0xff] }
0x145e   : > { %v2676_v48 = vpop.f32.mrb[72].mxu1 }
0x145f   : > { %v3860_v49 = vpop.f32.mrb[73].mxu1  ;;  %v2677_v52 = vadd.f32 %v3503_v47, %v2676_v48 }
0x1460   : > { %v2679_v50 = vpop.f32.mrb[74].mxu1 }
0x1461   : > { %v2680_v53 = vadd.f32 %v3503_v47, %v2679_v50  ;;  %v3861_v54 = vpop.f32.mrb[75].mxu1 }
0x1463   : > { %v2683_v55 = vpack.c.bf16 %v2680_v53, %v2677_v52 }
0x1465   : > { %3865 = vmatmul.mubr.msk.bf16.vlgmr.msra.gmra.mrb[72].mxu0 %vm624_vm3, %v2683_v55  ;;  %3871 = vmatmul.mubr.msk.bf16.vlgmr.msra.gmra.mrb[76].mxu1 %vm624_vm3, %v2683_v55 }
0x1466   : > { %3875 = vmatpush3.bf16.msra.mxu0 %v2806_v18  ;;  %3876 = vmatprep.mubr.msk.bf16.mxu0 %vm4328_vm0, %v4327_v0 }
0x1467   : > { %3882 = vmatprep.mubr.msk.bf16.mxu1 %vm4328_vm0, %v4327_v0  ;;  %3886 = vmatprep.subr.bf16.mxu0 %v4327_v0 }
0x146d   : > { %3877 = vmatmul.mubr.msk.bf16.vlgmr.msra.gmra.mrb[76].mxu0 %vm624_vm3, %v2683_v55 }
0x146e   : > { %3888 = vmatprep.mubr.msk.bf16.mxu0 %vm4328_vm0, %v4327_v0 }
0x1538   : > { %v2734_v56 = vpop.f32.mrb[72].mxu0  ;;  %v2788_v58 = vpop.f32.mrb[76].mxu1 }
0x1539   : > { %v2735_v61 = vadd.f32 %v3507_v21, %v2734_v56  ;;  %v3866_v62 = vpop.f32.mrb[73].mxu0  ;;  %v3872_v63 = vpop.f32.mrb[77].mxu1  ;;  %v2789_v1 = vadd.f32 %v3510_v57, %v2788_v58 }
0x153a   : > { %v2737_v59 = vpop.f32.mrb[74].mxu0  ;;  %v2791_v60 = vpop.f32.mrb[78].mxu1 }
0x153b   : > { %v2738_v2 = vadd.f32 %v3507_v21, %v2737_v59  ;;  %v2792_v4 = vadd.f32 %v3510_v57, %v2791_v60  ;;  %v3867_v5 = vpop.f32.mrb[75].mxu0  ;;  %v3873_v6 = vpop.f32.mrb[79].mxu1  ;;  %v2849_v7 = vmul.f32 0.35355338, %v2735_v61 }
0x153c   : > { %v3515_v6 = vld [vmem:[%s5073_s10 + $0xc] sm:$0xf] }
0x153d   : > { %v2850_v8 = vmul.f32 0.35355338, %v2738_v2  ;;  %v2852_v9 = vpack.c.bf16 %v2792_v4, %v2789_v1 }
0x153f   : > { %v2851_v10 = vpack.c.bf16 %v2850_v8, %v2849_v7  ;;  %2975 = vrot.lane.b32.xlu0 %v2852_v9, %s4329_s19  ;;  %v2860_v11 = vsel %vm783_vm4, %v2852_v9, 0 }
0x1540   : > { %v2842_v13 = vpop.f32.mrb[76].mxu0  ;;  %3881 = vmatpush3.bf16.xpose.msra.mxu1 %v2860_v11  ;;  %v3520_v11 = vcombine.low %v3515_v6, %v3515_v6 }
0x1541   : > { %2972 = vrot.lane.b32.xlu1 %v2851_v10, %s4329_s19  ;;  %v3878_v14 = vpop.f32.mrb[77].mxu0  ;;  %3892 = vmatprep.subr.bf16.mxu1 %v4327_v0  ;;  %v2843_v16 = vadd.f32 %v3513_v12, %v2842_v13 }
0x1542   : > { %v2845_v15 = vpop.f32.mrb[78].mxu0 }
0x1543   : > { %v2846_v17 = vadd.f32 %v3513_v12, %v2845_v15  ;;  %v3879_v19 = vpop.f32.mrb[79].mxu0  ;;  %v3099_v12 = vrot.slane %v3520_v11, 2 }
0x1545   : > { %v2853_v20 = vpack.c.bf16 %v2846_v17, %v2843_v16  ;;  %v3104_v13 = vsel %vm1032_vm6, %v3099_v12, 0 }
0x1547   : > { %3883 = vmatmul.mubr.msk.bf16.vlgmr.msra.gmra.mrb[80].mxu1 %vm783_vm4, %v2851_v10  ;;  %3887 = vmatpush3.bf16.msra.mxu0 %v2853_v20  ;;  %v3151_v10 = vsel %vm1032_vm6, %v3515_v6, 0 }
0x1548   : > { %3894 = vmatprep.mubr.msk.bf16.mxu1 %vm4328_vm0, %v4327_v0  ;;  %3898 = vmatprep.subr.bf16.mxu0 %v4327_v0 }
0x15b1   : > { %v2976_v22 = vpop.permute.xlu0 %2975 }
0x15b2   : > { %v2981_v23 = vsel %vm783_vm4, %v2976_v22, 0 }
0x15b3   : > { %3893 = vmatpush3.bf16.xpose.msra.mxu1 %v2981_v23  ;;  %v2973_v24 = vpop.permute.xlu1 %2972 }
0x15b4   : > { %3904 = vmatprep.subr.bf16.mxu1 %v4327_v0 }
0x15ba   : > { %3895 = vmatmul.mubr.msk.bf16.vlgmr.msra.gmra.mrb[84].mxu1 %vm783_vm4, %v2973_v24 }
0x15bb   : > { %3906 = vmatprep.mubr.msk.bf16.mxu1 %vm4328_vm0, %v4327_v0  ;;  %3905 = vmatpush3.bf16.msra.mxu1 %v3104_v13 }
0x15bc   : > { %3916 = vmatprep.subr.bf16.mxu1 %v4327_v0 }
0x161a   : > { %v2896_v25 = vpop.f32.mrb[80].mxu1 }
0x161b   : > { %v3884_v26 = vpop.f32.mrb[81].mxu1  ;;  %v2903_v27 = vsel %vm831_vm5, %v2896_v25, -inf }
0x161c   : > { %2904 = vmax.xlane.f32.xlu1 %v2903_v27  ;;  %v2899_v3 = vpop.f32.mrb[82].mxu1  ;;  %v3206_v26 = vld [vmem:[#allocation10 + $0xc] sm:$0xf] }
0x161d   : > { %v3885_v28 = vpop.f32.mrb[83].mxu1  ;;  %v2906_v29 = vsel %vm831_vm5, %v2899_v3, -inf  ;;  %v3211_v27 = vsel %vm628_vm2, %v3206_v26, 0 }
0x161e   : > { %2907 = vmax.xlane.f32.xlu0 %v2906_v29 }
0x168d   : > { %v3017_v30 = vpop.f32.mrb[84].mxu1 }
0x168e   : > { %v3896_v31 = vpop.f32.mrb[85].mxu1  ;;  %v3024_v32 = vsel %vm831_vm5, %v3017_v30, -inf }
0x168f   : > { %3025 = vmax.xlane.f32.xlu0 %v3024_v32  ;;  %v3020_v33 = vpop.f32.mrb[86].mxu1 }
0x1690   : > { %v3897_v34 = vpop.f32.mrb[87].mxu1  ;;  %v3027_v35 = vsel %vm831_vm5, %v3020_v33, -inf }
0x1691   : > { %3028 = vmax.xlane.f32.xlu1 %v3027_v35  ;;  %v3524_v34 = vld [vmem:[%s5074_s11 + $0x3] ss:$0 sm:$0xff] }
0x16a9   : > { %v2905_v36 = vpop.xlane.xlu1 %2904 }
0x16aa   : > { %v2909_v37 = vsub.f32 %v2896_v25, %v2905_v36 }
0x16ab   : > { %v2908_v38 = vpop.xlane.xlu0 %2907 }
0x16ac   : > { %v2911_v39 = vmul.f32 1.442695, %v2909_v37  ;;  %v2910_v40 = vsub.f32 %v2899_v3, %v2908_v38 }
0x16ae   : > { %4085 = vpow2.f32 %v2911_v39  ;;  %v2913_v41 = vmul.f32 1.442695, %v2910_v40 }
0x16b0   : > { %4087 = vpow2.f32 %v2913_v41  ;;  %v3526_v41 = vld [vmem:[%s5116_s5] ss:$0 sm:$0xff] }
0x16b8   : > { %v4086_v43 = vpop.eup %4085 }
0x16b9   : > { %v2915_v44 = vsel %vm831_vm5, %v4086_v43, 0.0 }
0x16ba   : > { %v4088_v46 = vpop.eup %4087  ;;  %2916 = vadd.xlane.f32.xlu0 %v2915_v44 }
0x16bb   : > { %v2918_v47 = vsel %vm831_vm5, %v4088_v46, 0.0 }
0x16bc   : > { %2919 = vadd.xlane.f32.xlu1 %v2918_v47 }
0x171c   : > { %v3026_v48 = vpop.xlane.xlu0 %3025 }
0x171d   : > { %v3030_v49 = vsub.f32 %v3017_v30, %v3026_v48 }
0x171e   : > { %v3029_v50 = vpop.xlane.xlu1 %3028 }
0x171f   : > { %v3032_v51 = vmul.f32 1.442695, %v3030_v49  ;;  %v3031_v52 = vsub.f32 %v3020_v33, %v3029_v50 }
0x1721   : > { %4089 = vpow2.f32 %v3032_v51  ;;  %v3034_v53 = vmul.f32 1.442695, %v3031_v52 }
0x1723   : > { %4091 = vpow2.f32 %v3034_v53 }
0x172b   : > { %v4090_v54 = vpop.eup %4089 }
0x172c   : > { %v3036_v55 = vsel %vm831_vm5, %v4090_v54, 0.0 }
0x172d   : > { %v4092_v18 = vpop.eup %4091  ;;  %3037 = vadd.xlane.f32.xlu0 %v3036_v55 }
0x172e   : > { %v3039_v21 = vsel %vm831_vm5, %v4092_v18, 0.0 }
0x172f   : > { %3040 = vadd.xlane.f32.xlu1 %v3039_v21 }
0x1743   : > { %3048 = vrot.lane.b32.xlu0 %v2853_v20, %s4329_s19  ;;  %s4242_s19 = scalar_lea.vmem %s5018_s18, 256 }
0x1744   : > { %p4243_p8 = scmp.ne.s32.totalorder %s5018_s18, %s4242_s19  ;;  %p4250_p9 = scmp.lt.s32.totalorder %s4248_s22, %s4242_s19 }
0x1746   : > { %p4244_p13 = pnand %p4243_p8, %p5119_p11  ;;  %p4251_p5 = por %p4250_p9, %p4249_p6 }
0x1747   : > { %v2917_v56 = vpop.xlane.xlu0 %2916 }
0x1748   : > { %4093 = vrcp.f32 %v2917_v56  ;;  %p4245_p1 = pneg %p4244_p13 }
0x1749   : > { %v2920_v57 = vpop.xlane.xlu1 %2919 }
0x174a   : > { %4095 = vrcp.f32 %v2920_v57  ;;  %p4252_p10 = pnand %p4251_p5, %p4245_p1 }
0x1752   : > { %v4094_v58 = vpop.eup %4093 }
0x1753   : > { %v2923_v62 = vmul.f32 %v4094_v58, %v4086_v43 }
0x1754   : > { %v4096_v61 = vpop.eup %4095 }
0x1755   : > { %v2924_v63 = vmul.f32 %v4096_v61, %v4088_v46 }
0x1757   : > { %v2925_v59 = vpack.c.bf16 %v2924_v63, %v2923_v62 }
0x1759   : > { %3889 = vmatmul.mubr.msk.bf16.vlgmr.msra.gmra.mrb[80].mxu0 %vm831_vm5, %v2925_v59 }
0x175a   : > { %3900 = vmatprep.mubr.msk.bf16.mxu0 %vm4328_vm0, %v4327_v0 }
0x17ba   : > { %v3038_v60 = vpop.xlane.xlu0 %3037 }
0x17bb   : > { %4097 = vrcp.f32 %v3038_v60 }
0x17bc   : > { %v3041_v1 = vpop.xlane.xlu1 %3040 }
0x17bd   : > { %4099 = vrcp.f32 %v3041_v1 }
0x17be   : > { %v3049_v2 = vpop.permute.xlu0 %3048 }
0x17bf   : > { %3899 = vmatpush3.bf16.msra.mxu0 %v3049_v2 }
0x17c0   : > { %3910 = vmatprep.subr.bf16.mxu0 %v4327_v0 }
0x17c5   : > { %v4098_v4 = vpop.eup %4097 }
0x17c6   : > { %v3044_v7 = vmul.f32 %v4098_v4, %v4090_v54 }
0x17c7   : > { %v4100_v5 = vpop.eup %4099 }
0x17c8   : > { %v3045_v8 = vmul.f32 %v4100_v5, %v4092_v18 }
0x17ca   : > { %v3046_v9 = vpack.c.bf16 %v3045_v8, %v3044_v7 }
0x17cc   : > { %3901 = vmatmul.mubr.msk.bf16.vlgmr.msra.gmra.mrb[84].mxu0 %vm831_vm5, %v3046_v9 }
0x17cd   : > { %3911 = vmatpush3.bf16.msra.mxu0 %v3151_v10  ;;  %3912 = vmatprep.mubr.msk.bf16.mxu0 %vm4328_vm0, %v4327_v0 }
0x182c   : > { %v2963_v14 = vpop.f32.mrb[80].mxu0 }
0x182d   : > { %v3890_v15 = vpop.f32.mrb[81].mxu0 }
0x182e   : > { %v2966_v16 = vpop.f32.mrb[82].mxu0 }
0x182f   : > { %v2970_v17 = vpack.c.bf16 %v2966_v16, %v2963_v14  ;;  %v3891_v19 = vpop.f32.mrb[83].mxu0 }
0x1831   : > { %3913 = vmatmul.mubr.msk.bf16.vlgmr.msra.gmra.mrb[88].mxu0 %vm783_vm4, %v2970_v17 }
0x189f   : > { %v3088_v20 = vpop.f32.mrb[84].mxu0 }
0x18a0   : > { %v3902_v22 = vpop.f32.mrb[85].mxu0 }
0x18a1   : > { %v3091_v23 = vpop.f32.mrb[86].mxu0 }
0x18a2   : > { %v3095_v24 = vpack.c.bf16 %v3091_v23, %v3088_v20  ;;  %v3903_v25 = vpop.f32.mrb[87].mxu0 }
0x18a4   : > { %3907 = vmatmul.mubr.msk.bf16.vlgmr.msra.gmra.mrb[88].mxu1 %vm783_vm4, %v3095_v24 }
0x18a5   : > { %3918 = vmatprep.mubr.msk.bf16.mxu1 %vm4328_vm0, %v4327_v0  ;;  %3917 = vmatpush3.bf16.msra.mxu1 %v3211_v27 }
0x1904   : > { %v3187_v3 = vpop.f32.mrb[88].mxu0 }
0x1905   : > { %v3914_v28 = vpop.f32.mrb[89].mxu0 }
0x1906   : > { %v3190_v29 = vpop.f32.mrb[90].mxu0 }
0x1907   : > { %v3915_v30 = vpop.f32.mrb[91].mxu0 }
0x1977   : > { %v3140_v31 = vpop.f32.mrb[88].mxu1 }
0x1978   : > { %v3188_v32 = vadd.f32 %v3187_v3, %v3140_v31  ;;  %v3908_v33 = vpop.f32.mrb[89].mxu1 }
0x1979   : > { %v3143_v35 = vpop.f32.mrb[90].mxu1 }
0x197a   : > { %v3191_v36 = vadd.f32 %v3190_v29, %v3143_v35  ;;  %v3909_v0 = vpop.f32.mrb[91].mxu1  ;;  %v3202_v37 = vadd.f32 %v3524_v34, %v3188_v32 }
0x197c   : > { %v3203_v38 = vadd.f32 %v3524_v34, %v3191_v36 }
0x197e   : > { %v3204_v39 = vpack.c.bf16 %v3203_v38, %v3202_v37 }
0x1980   : > { %3919 = vmatmul.mubr.msk.bf16.vlgmr.msra.gmra.mrb[92].mxu1 %vm624_vm3, %v3204_v39 }
0x1a53   : > { %v3247_v40 = vpop.f32.mrb[92].mxu1 }
0x1a54   : > { %v3254_v43 = vadd.f32 %v3247_v40, %v4943_v42  ;;  %v3920_v44 = vpop.f32.mrb[93].mxu1 }
0x1a55   : > { %v3250_v46 = vpop.f32.mrb[94].mxu1 }
0x1a56   : > { %v3263_v47 = vadd.f32 %v3526_v41, %v3254_v43  ;;  %v3255_v48 = vadd.f32 %v3250_v46, %v4946_v45  ;;  %v3921_v49 = vpop.f32.mrb[95].mxu1 }
0x1a58   : > { %3265 = vst.msk [vmem:[%s533_s26] sm:$0xff] %vm570_vm1, %v3263_v47  ;;  %v3264_v42 = vadd.f32 %v3526_v41, %v3255_v48 }
0x1a5a   : > { %3266 = vst.msk [vmem:[%s533_s26 + $0x8] sm:$0xff] %vm570_vm1, %v3264_v42 }
0x1a5b   : > { %4255 = shalt.err (!%p4252_p10)
}
0x1a5c   : > { %s4256_s16 = scalar_lea.hbm %s5016_s20, 256  ;;  %s4260_s24 = scalar_lea.hbm %s5118_s27, 512 }
0x1a5d   : > { %p4257_p0 = scmp.ne.s32.totalorder %s5016_s20, %s4256_s16  ;;  %p4261_p4 = scmp.lt.u32.totalorder %s5016_s20, %s5118_s27 }
0x1a5e   : > { %p4262_p12 = scmp.lt.u32.totalorder %s4260_s24, %s4256_s16  ;;  %p4264_p8 = scmp.lt.u32.totalorder %s4256_s16, %s5016_s20 }
0x1a5f   : > { %p4258_p2 = pnand %p4257_p0, %p5119_p11 }
0x1a60   : > { %p4263_p7 = por %p4262_p12, %p4261_p4 }
0x1a61   : > { %p4259_p3 = pneg %p4258_p2 }
0x1a62   : > { %p4265_p13 = por %p4264_p8, %p4263_p7 }
0x1a64   : > { %p4266_p1 = pnand %p4265_p13, %p4259_p3 }
0x1a66   : > { %4269 = shalt.err (!%p4266_p1)
}
0x1a67   : > { %s4331_s23 = smov 128   ;;  %s4332_s26 = smov 8  }
0x1a68   : > { %3942 = dma.vmem_to_hbm [thread:$0]  (%p5119_p11), %s5018_s18, 256, %s5016_s20, %s5022_s17, %s4331_s23, %s4331_s23, %s4332_s26  }
0x1a69 PF: > { %s5120_s21 = sld [smem:[#allocation19_spill]]  ;;  %s5121_s29 = sld [smem:[#allocation16_spill]] }
0x1a6a   : > { %s5122_s19 = sld [smem:[#allocation23_spill]] }
0x1a6f   : > { %p3974_p6 = scmp.ge.s32.totalorder %s5120_s21, 2  ;;  %s3296_s15 = sand.u32 1, %s5121_s29  }
0x1a70   : > { %p5123_p9 = scmp.ne.s32.totalorder %s5122_s19, 0  ;;  %s3297_s30 = scalar_lea.sflag [#allocation4], %s3296_s15 }
0x1a72   : > { %p3961_p5 = pnand %p3974_p6, %p5123_p9 }
0x1a74   : > { %4299 = dma.done.wait (!%p3961_p5), %s3297_s30, 256  }
0x1a75   : > { %4301 = vsyncadd (!%p3961_p5), %s3297_s30, 4294967040  ;;  %s5124_s16 = sld [smem:[#allocation20_spill]]  ;;  %s5125_s29 = sld [smem:[#allocation17_spill]] }
0x1a76   : > { %s5126_s30 = sld [smem:[#allocation18_spill]]  ;;  %s5127_s15 = sld [smem:[#allocation21_spill]] }
0x1a7b   : > { %p27_p10 = scmp.ge.s32.totalorder %s5124_s16, 4  }
0x1a7d   :  { %29 = sbr.rel (!%p27_p10) target bundleno = 10 (0xa), region = 168 }
0x1a84   :  { %3302 = vsyncpa [#allocation3], 1 }
0x1a85   :  { %3304 = vsyncpa [#allocation3 + $0x1], 1 }
0x1a86   :  { %3305 = vsyncpa [#allocation6], 1 }
0x1a87   :  { %3306 = vsyncpa [#allocation9], 1 }
0x1a88   :  { %3307 = vsyncpa [#allocation4], 1 }
0x1a89   :  { %3309 = vsyncpa [#allocation4 + $0x1], 1 }

</bundles_post_ra>
